<compile_context>
chip_gen: v5e
topology: v5e:2x2
jax: 0.10.0
libtpu: 0.0.40
codegen_flags: <defaults>
</compile_context>

<pallas_src>
import jax
import jax.numpy as jnp
from jax.experimental import pallas as pl
from jax.experimental.pallas import tpu as pltpu


# ------------------------- Pallas kernels -------------------------

def _intent_kernel(x_ref, w_ref, b_ref, o_ref):
    # x_ref: (TB, C, P) native layout; w_ref: (C, N) pre-scaled by 1/P;
    # b_ref: (1, N); o_ref: (TB, N)
    pooled = jnp.sum(x_ref[...], axis=-1, dtype=jnp.float32)        # lane reduce -> (TB, C)
    logits = jnp.dot(pooled, w_ref[...],
                     preferred_element_type=jnp.float32) + b_ref[...]
    o_ref[...] = logits.astype(o_ref.dtype)


def _merge_intent_kernel(x_ref, roi_ref, wx_ref, wr_ref, b_ref, o_ref):
    # cat([pooled, roi]) @ W  ==  pooled @ W[:1024] + roi @ W[1024:]
    # x_ref: (TB, C, P); roi_ref: (TB, C); wx_ref pre-scaled by 1/P; wr_ref unscaled.
    pooled = jnp.sum(x_ref[...], axis=-1, dtype=jnp.float32)
    logits = (jnp.dot(pooled, wx_ref[...], preferred_element_type=jnp.float32)
              + jnp.dot(roi_ref[...].astype(jnp.float32), wr_ref[...],
                        preferred_element_type=jnp.float32)
              + b_ref[...])
    o_ref[...] = logits.astype(o_ref.dtype)


# ------------------------- wrapper -------------------------

def intent_net_forward(x, params, roi_features=None, *, batch_tile=8):
    """x: (B, C, T, H, W) f32 or bf16 (NCTHW, matching PyTorch). Eval mode (dropout=id).

    `params` must be the kernel-ready dict from `prepare_params` (pool divisor
    folded into the x-side weights).
    """
    B, C, T, H, W = x.shape
    assert (T, H, W) == (2, 7, 7), "avg_pool3d kernel (2,7,7) must consume T,H,W exactly"
    P = T * H * W
    # Contiguous collapse of trailing dims only -> free (no HBM transpose).
    x_r = x.reshape(B, C, P)

    N = params["cls_w_scaled"].shape[1]
    out_shape = jax.ShapeDtypeStruct((B, N), jnp.float32)

    TB = max(1, min(batch_tile, B))          # ~392 KB/f32 row; TB<=8 fits every gen.
    grid = (pl.cdiv(B, TB),)

    x_spec = pl.BlockSpec((TB, C, P), lambda b: (b, 0, 0))
    w_spec = pl.BlockSpec((C, N), lambda b: (0, 0))          # resident across grid
    b_spec = pl.BlockSpec((1, N), lambda b: (0, 0))
    o_spec = pl.BlockSpec((TB, N), lambda b: (b, 0))
    cparams = pltpu.CompilerParams(dimension_semantics=("parallel",))

    if roi_features is None:
        return pl.pallas_call(
            _intent_kernel,
            out_shape=out_shape,
            grid=grid,
            in_specs=[x_spec, w_spec, b_spec],
            out_specs=o_spec,
            compiler_params=cparams,
        )(x_r, params["cls_w_scaled"], params["cls_b"])
    else:
        roi_spec = pl.BlockSpec((TB, C), lambda b: (b, 0))
        return pl.pallas_call(
            _merge_intent_kernel,
            out_shape=out_shape,
            grid=grid,
            in_specs=[x_spec, roi_spec, w_spec, w_spec, b_spec],
            out_specs=o_spec,
            compiler_params=cparams,
        )(x_r, roi_features, params["merge_w_x_scaled"],
          params["merge_w_roi"], params["merge_b"])


# ------------------------- parameters -------------------------

def init_params(key, num_intent=8, feat_dim=1024):
    """Deterministic synthetic parameters (PyTorch-Linear-like uniform init).

    Returned weights are 'raw' (PyTorch semantics, stored transposed as
    (in_features, out_features)).
    """
    k1, k2, k3, k4 = jax.random.split(key, 4)
    lim1 = 1.0 / jnp.sqrt(feat_dim)
    lim2 = 1.0 / jnp.sqrt(2 * feat_dim)
    cls_w = jax.random.uniform(k1, (feat_dim, num_intent), jnp.float32, -lim1, lim1)
    cls_b = jax.random.uniform(k2, (1, num_intent), jnp.float32, -lim1, lim1)
    merge_w = jax.random.uniform(k3, (2 * feat_dim, num_intent), jnp.float32, -lim2, lim2)
    merge_b = jax.random.uniform(k4, (1, num_intent), jnp.float32, -lim2, lim2)
    return {
        "cls_w": cls_w,
        "cls_b": cls_b,
        "merge_w_x": merge_w[:feat_dim],
        "merge_w_roi": merge_w[feat_dim:],
        "merge_b": merge_b,
    }


def prepare_params(raw, pool_size):
    """One-time fold of the 1/pool_size avg-pool divisor into the x-side weights."""
    inv = jnp.float32(1.0 / pool_size)
    return {
        "cls_w_scaled": raw["cls_w"] * inv,
        "cls_b": raw["cls_b"],
        "merge_w_x_scaled": raw["merge_w_x"] * inv,
        "merge_w_roi": raw["merge_w_roi"],
        "merge_b": raw["merge_b"],
    }


# TODO(synk): training-mode dropout (p=0.5) is not implemented; eval semantics only.

if __name__ == "__main__":
    key = jax.random.PRNGKey(0)
    kx, kr, kp = jax.random.split(key, 3)

    B, C, T, H, W = 2, 1024, 2, 7, 7          # Linear(1024, ...) fixes C; pool fixes T,H,W
    NUM_INTENT = 8

    x = jax.random.normal(kx, (B, C, T, H, W), dtype=jnp.float32)
    roi = jax.random.normal(kr, (B, C), dtype=jnp.float32)
    raw = init_params(kp, num_intent=NUM_INTENT, feat_dim=C)
    params = prepare_params(raw, pool_size=T * H * W)

    # classifier path (roi_features=None)
    out1 = intent_net_forward(x, params)
    # merge_classifier path
    out2 = intent_net_forward(x, params, roi_features=roi)
    # bf16 activation path (upstream backbone in bf16) -- no extra casts in wrapper
    x_bf16 = x.astype(jnp.bfloat16)
    roi_bf16 = roi.astype(jnp.bfloat16)
    out3 = intent_net_forward(x_bf16, params, roi_features=roi_bf16)

    jax.block_until_ready((out1, out2, out3))

    # sanity vs. pure-JAX reference (raw, unscaled weights; mean pooling)
    pooled_ref = jnp.mean(x.reshape(B, C, -1), axis=-1)
    ref1 = pooled_ref @ raw["cls_w"] + raw["cls_b"]
    merge_w_full = jnp.concatenate([raw["merge_w_x"], raw["merge_w_roi"]], axis=0)
    ref2 = (jnp.concatenate([pooled_ref, roi], axis=-1) @ merge_w_full + raw["merge_b"])
    pooled_bf = jnp.mean(x_bf16.astype(jnp.float32).reshape(B, C, -1), axis=-1)
    ref3 = (jnp.concatenate([pooled_bf, roi_bf16.astype(jnp.float32)], axis=-1)
            @ merge_w_full + raw["merge_b"])

    assert jnp.allclose(out1, ref1, atol=1e-4), "classifier path mismatch"
    assert jnp.allclose(out2, ref2, atol=1e-4), "merge path mismatch"
    assert jnp.allclose(out3, ref3, atol=2e-2), "bf16 merge path mismatch"
    assert out1.shape == (B, NUM_INTENT) and out2.shape == (B, NUM_INTENT)
    assert out3.shape == (B, NUM_INTENT)

    print("KERNEL_OK")
</pallas_src>

<mosaic_0001>
module attributes {stable_mosaic.version = 11 : i64} {
  func.func @_intent_kernel(%arg0: i32, %arg1: memref<2x1024x98xf32, #tpu.memory_space<vmem>>, %arg2: memref<1024x8xf32, #tpu.memory_space<vmem>>, %arg3: memref<1x8xf32, #tpu.memory_space<vmem>>, %arg4: memref<2x8xf32, #tpu.memory_space<vmem>>) attributes {dimension_semantics = [#tpu.dimension_semantics<parallel>], iteration_bounds = array<i64: 1>, scalar_prefetch = 0 : i64, scratch_operands = 0 : i64, tpu.core_type = #tpu.core_type<tc>, window_params = [{transform_indices = @transform_0, window_bounds = array<i64: 2, 1024, 98>}, {pipeline_mode = #tpu.pipeline_mode<synchronous>, transform_indices = @transform_1, window_bounds = array<i64: 1024, 8>}, {pipeline_mode = #tpu.pipeline_mode<synchronous>, transform_indices = @transform_2, window_bounds = array<i64: 1, 8>}, {transform_indices = @transform_3, window_bounds = array<i64: 2, 8>}]} {
    %c0 = arith.constant 0 : index
    %c0_0 = arith.constant 0 : index
    %c0_1 = arith.constant 0 : index
    %0 = vector.load %arg1[%c0, %c0_0, %c0_1] : memref<2x1024x98xf32, #tpu.memory_space<vmem>>, vector<2x1024x98xf32>
    %cst = arith.constant dense<0.000000e+00> : vector<2x1024xf32>
    %1 = vector.multi_reduction <add>, %0, %cst [2] : vector<2x1024x98xf32> to vector<2x1024xf32>
    %c0_2 = arith.constant 0 : index
    %c0_3 = arith.constant 0 : index
    %2 = vector.load %arg2[%c0_2, %c0_3] : memref<1024x8xf32, #tpu.memory_space<vmem>>, vector<1024x8xf32>
    %cst_4 = arith.constant dense<0.000000e+00> : vector<2x8xf32>
    %3 = tpu.matmul %1, %2, %cst_4 {dimension_numbers = #tpu.dot_dimension_numbers<[1], [0], [0], [1], [0, 0, 1, 1], [], []>} : vector<2x1024xf32>, vector<1024x8xf32>, vector<2x8xf32> -> vector<2x8xf32>
    %c0_5 = arith.constant 0 : index
    %c0_6 = arith.constant 0 : index
    %4 = vector.load %arg3[%c0_5, %c0_6] : memref<1x8xf32, #tpu.memory_space<vmem>>, vector<1x8xf32>
    %5 = vector.broadcast %4 : vector<1x8xf32> to vector<2x8xf32>
    %6 = arith.addf %3, %5 : vector<2x8xf32>
    %c0_7 = arith.constant 0 : index
    %c0_8 = arith.constant 0 : index
    %7 = vector.load %arg4[%c0_7, %c0_8] : memref<2x8xf32, #tpu.memory_space<vmem>>, vector<2x8xf32>
    tpu.vector_store %arg4[%c0_7, %c0_8], %6 {strides = array<i32>} : memref<2x8xf32, #tpu.memory_space<vmem>>, vector<2x8xf32>,
    return
  }
  func.func @transform_0(%arg0: i32) -> (i32, i32, i32) {
    %c0_i32 = arith.constant 0 : i32
    %c0_i32_0 = arith.constant 0 : i32
    %c0_i32_1 = arith.constant 0 : i32
    return %arg0, %c0_i32, %c0_i32_0 : i32, i32, i32
  }
  func.func @transform_1(%arg0: i32) -> (i32, i32) {
    %c0_i32 = arith.constant 0 : i32
    %c0_i32_0 = arith.constant 0 : i32
    %c0_i32_1 = arith.constant 0 : i32
    return %c0_i32, %c0_i32_0 : i32, i32
  }
  func.func @transform_2(%arg0: i32) -> (i32, i32) {
    %c0_i32 = arith.constant 0 : i32
    %c0_i32_0 = arith.constant 0 : i32
    %c0_i32_1 = arith.constant 0 : i32
    return %c0_i32, %c0_i32_0 : i32, i32
  }
  func.func @transform_3(%arg0: i32) -> (i32, i32) {
    %c0_i32 = arith.constant 0 : i32
    %c0_i32_0 = arith.constant 0 : i32
    return %arg0, %c0_i32 : i32, i32
  }
}

</mosaic_0001>

<bundles_post_ra>
// kernel: tpu_custom_call.1
= control target key start
LH: loop header
LB: loop body
LE: loop exit
PB: predicated region body
PF: predicated region fallthrough
CT: control target
= control target key end

     0   :  { %vm271_vm0 = vcmask 801792   ;;  %s4534_s0 = inlined_call_operand.vmem [shape: f32[2,1024,98], index: 0, kind: input, shape index: {}]   ;;  %s4535_s1 = inlined_call_operand.vmem [shape: f32[1024,8], index: 1, kind: input, shape index: {}]   ;;  %s4536_s2 = inlined_call_operand.vmem [shape: f32[1,8], index: 2, kind: input, shape index: {}]   ;;  %s4537_s3 = inlined_call_operand.hbm [shape: f32[2,8], index: 3, kind: output, shape index: {}]  }
   0x1   :  { %v19_v0 = vld [vmem:[%s4534_s0 + $0x20] sm:$0xff]  ;;  %v17_v1 = vld [vmem:[%s4534_s0 + $0x10] sm:$0xff]  ;;  %v20_v6 = vld [vmem:[%s4534_s0 + $0x28] sm:$0xff] }
   0x2   :  { %v15_v2 = vld [vmem:[%s4534_s0] sm:$0xff]  ;;  %v284_v3 = vsel %vm271_vm0, %v19_v0, 0.0  ;;  %v278_v4 = vsel %vm271_vm0, %v17_v1, 0.0  ;;  %v18_v7 = vld [vmem:[%s4534_s0 + $0x18] sm:$0xff]  ;;  %v16_v8 = vld [vmem:[%s4534_s0 + $0x8] sm:$0xff] }
   0x3   :  { %v272_v5 = vsel %vm271_vm0, %v15_v2, 0.0  ;;  %285 = vadd.xlane.f32.xlu2 %v284_v3  ;;  %279 = vadd.xlane.f32.xlu1 %v278_v4 }
   0x4   :  { %273 = vadd.xlane.f32.xlu0 %v272_v5 }
   0x5   :  { %8 = vsyncpa [#allocation3], 0  ;;  %v287_v9 = vsel %vm271_vm0, %v20_v6, 0.0  ;;  %v281_v10 = vsel %vm271_vm0, %v18_v7, 0.0  ;;  %v275_v11 = vsel %vm271_vm0, %v16_v8, 0.0  ;;  %v23_v12 = vld [vmem:[%s4534_s0 + $0x40] sm:$0xff] }
   0x6   :  { %v22_v13 = vld [vmem:[%s4534_s0 + $0x38] sm:$0xff]  ;;  %v21_v14 = vld [vmem:[%s4534_s0 + $0x30] sm:$0xff]  ;;  %v296_v15 = vsel %vm271_vm0, %v23_v12, 0.0  ;;  %v24_v20 = vld [vmem:[%s4534_s0 + $0x48] sm:$0xff]  ;;  %vm1433_vm1 = vcmask 130112   ;;  %vm1437_vm2 = vcmask 195712  }
   0x7   :  { %v293_v16 = vsel %vm271_vm0, %v22_v13, 0.0  ;;  %v290_v17 = vsel %vm271_vm0, %v21_v14, 0.0  ;;  %v26_v18 = vld [vmem:[%s4534_s0 + $0x58] sm:$0xff]  ;;  %v25_v19 = vld [vmem:[%s4534_s0 + $0x50] sm:$0xff]  ;;  %v299_v23 = vsel %vm271_vm0, %v24_v20, 0.0  ;;  %v28_v25 = vld [vmem:[%s4534_s0 + $0x68] sm:$0xff] }
   0x8   :  { %v305_v21 = vsel %vm271_vm0, %v26_v18, 0.0  ;;  %v302_v22 = vsel %vm271_vm0, %v25_v19, 0.0  ;;  %v29_v24 = vld [vmem:[%s4534_s0 + $0x70] sm:$0xff]  ;;  %v27_v26 = vld [vmem:[%s4534_s0 + $0x60] sm:$0xff]  ;;  %v311_v28 = vsel %vm271_vm0, %v28_v25, 0.0  ;;  %v32_v30 = vld [vmem:[%s4534_s0 + $0x88] sm:$0xff] }
   0x9   :  { %v314_v27 = vsel %vm271_vm0, %v29_v24, 0.0  ;;  %v308_v29 = vsel %vm271_vm0, %v27_v26, 0.0  ;;  %v31_v31 = vld [vmem:[%s4534_s0 + $0x80] sm:$0xff]  ;;  %v30_v32 = vld [vmem:[%s4534_s0 + $0x78] sm:$0xff]  ;;  %v323_v33 = vsel %vm271_vm0, %v32_v30, 0.0  ;;  %v33_v38 = vld [vmem:[%s4534_s0 + $0x90] sm:$0xff] }
   0xa   :  { %v320_v34 = vsel %vm271_vm0, %v31_v31, 0.0  ;;  %v317_v35 = vsel %vm271_vm0, %v30_v32, 0.0  ;;  %v35_v36 = vld [vmem:[%s4534_s0 + $0xa0] sm:$0xff]  ;;  %v34_v37 = vld [vmem:[%s4534_s0 + $0x98] sm:$0xff]  ;;  %v326_v41 = vsel %vm271_vm0, %v33_v38, 0.0  ;;  %v37_v43 = vld [vmem:[%s4534_s0 + $0xb0] sm:$0xff] }
   0xb   :  { %288 = vadd.xlane.f32.xlu2 %v287_v9  ;;  %282 = vadd.xlane.f32.xlu1 %v281_v10  ;;  %v332_v39 = vsel %vm271_vm0, %v35_v36, 0.0  ;;  %v329_v40 = vsel %vm271_vm0, %v34_v37, 0.0  ;;  %v38_v42 = vld [vmem:[%s4534_s0 + $0xb8] sm:$0xff]  ;;  %v36_v44 = vld [vmem:[%s4534_s0 + $0xa8] sm:$0xff]  ;;  %v338_v46 = vsel %vm271_vm0, %v37_v43, 0.0  ;;  %v41_v48 = vld [vmem:[%s4534_s0 + $0xd0] sm:$0xff] }
   0xc   :  { %276 = vadd.xlane.f32.xlu0 %v275_v11  ;;  %v341_v45 = vsel %vm271_vm0, %v38_v42, 0.0  ;;  %v335_v47 = vsel %vm271_vm0, %v36_v44, 0.0  ;;  %v40_v49 = vld [vmem:[%s4534_s0 + $0xc8] sm:$0xff]  ;;  %v39_v50 = vld [vmem:[%s4534_s0 + $0xc0] sm:$0xff]  ;;  %v350_v51 = vsel %vm271_vm0, %v41_v48, 0.0  ;;  %v42_v56 = vld [vmem:[%s4534_s0 + $0xd8] sm:$0xff] }
   0xd   :  { %v347_v52 = vsel %vm271_vm0, %v40_v49, 0.0  ;;  %v344_v53 = vsel %vm271_vm0, %v39_v50, 0.0  ;;  %v44_v54 = vld [vmem:[%s4534_s0 + $0xe8] sm:$0xff]  ;;  %v43_v55 = vld [vmem:[%s4534_s0 + $0xe0] sm:$0xff]  ;;  %v353_v59 = vsel %vm271_vm0, %v42_v56, 0.0  ;;  %v46_v61 = vld [vmem:[%s4534_s0 + $0xf8] sm:$0xff] }
   0xe   :  { %v359_v57 = vsel %vm271_vm0, %v44_v54, 0.0  ;;  %v356_v58 = vsel %vm271_vm0, %v43_v55, 0.0  ;;  %v47_v60 = vld [vmem:[%s4534_s0 + $0x100] sm:$0xff]  ;;  %v45_v62 = vld [vmem:[%s4534_s0 + $0xf0] sm:$0xff]  ;;  %v365_v0 = vsel %vm271_vm0, %v46_v61, 0.0  ;;  %v50_v2 = vld [vmem:[%s4534_s0 + $0x118] sm:$0xff] }
   0xf   :  { %v368_v63 = vsel %vm271_vm0, %v47_v60, 0.0  ;;  %v362_v1 = vsel %vm271_vm0, %v45_v62, 0.0  ;;  %v49_v3 = vld [vmem:[%s4534_s0 + $0x110] sm:$0xff]  ;;  %v48_v4 = vld [vmem:[%s4534_s0 + $0x108] sm:$0xff]  ;;  %v377_v5 = vsel %vm271_vm0, %v50_v2, 0.0  ;;  %v51_v10 = vld [vmem:[%s4534_s0 + $0x120] sm:$0xff] }
  0x10   :  { %v374_v6 = vsel %vm271_vm0, %v49_v3, 0.0  ;;  %v371_v7 = vsel %vm271_vm0, %v48_v4, 0.0  ;;  %v53_v8 = vld [vmem:[%s4534_s0 + $0x130] sm:$0xff]  ;;  %v52_v9 = vld [vmem:[%s4534_s0 + $0x128] sm:$0xff]  ;;  %v380_v13 = vsel %vm271_vm0, %v51_v10, 0.0  ;;  %v59_v20 = vld [vmem:[%s4534_s0 + $0x160] sm:$0xff] }
  0x11   :  { %v386_v11 = vsel %vm271_vm0, %v53_v8, 0.0  ;;  %v383_v12 = vsel %vm271_vm0, %v52_v9, 0.0  ;;  %v56_v14 = vld [vmem:[%s4534_s0 + $0x148] sm:$0xff]  ;;  %v62_v26 = vld [vmem:[%s4534_s0 + $0x178] sm:$0xff]  ;;  %vm1441_vm3 = vcmask 261312   ;;  %vm1445_vm4 = vcmask 326912  }
  0x12   :  { %v60_v30 = vld [vmem:[%s4534_s0 + $0x168] sm:$0xff]  ;;  %v413_v32 = vsel %vm271_vm0, %v62_v26, 0.0  ;;  %v66_v48 = vld [vmem:[%s4534_s0 + $0x198] sm:$0xff]  ;;  %vm1449_vm5 = vcmask 392512   ;;  %vm1453_vm6 = vcmask 458112   ;;  %vm1457_vm7 = vcmask 523712  }
  0x13   :  { %297 = vadd.xlane.f32.xlu2 %v296_v15  ;;  %294 = vadd.xlane.f32.xlu1 %v293_v16  ;;  %v55_v15 = vld [vmem:[%s4534_s0 + $0x140] sm:$0xff]  ;;  %v54_v16 = vld [vmem:[%s4534_s0 + $0x138] sm:$0xff]  ;;  %v64_v36 = vld [vmem:[%s4534_s0 + $0x188] sm:$0xff]  ;;  %vm4541_vm8 = vcmask 589312   ;;  %vm4539_vm9 = vcmask 654912   ;;  %vm4540_vm10 = vcmask 720512  }
  0x14   :  { %291 = vadd.xlane.f32.xlu0 %v290_v17  ;;  %v395_v17 = vsel %vm271_vm0, %v56_v14, 0.0  ;;  %v392_v18 = vsel %vm271_vm0, %v55_v15, 0.0  ;;  %v389_v19 = vsel %vm271_vm0, %v54_v16, 0.0  ;;  %v419_v42 = vsel %vm271_vm0, %v64_v36, 0.0  ;;  %v68_v44 = vld [vmem:[%s4534_s0 + $0x1a8] sm:$0xff]  ;;  %v70_v54 = vld [vmem:[%s4534_s0 + $0x1b8] sm:$0xff] }
  0x15   :  { %v431_v50 = vsel %vm271_vm0, %v68_v44, 0.0  ;;  %v437_v60 = vsel %vm271_vm0, %v70_v54, 0.0  ;;  %v74_v62 = vld [vmem:[%s4534_s0 + $0x1d8] sm:$0xff]  ;;  %v72_v2 = vld [vmem:[%s4534_s0 + $0x1c8] sm:$0xff]  ;;  %vm4538_vm11 = vcmask 786112   ;;  %vm1477_vm12 = vcmask 851712  }
  0x16   :  { %v449_v4 = vsel %vm271_vm0, %v74_v62, 0.0  ;;  %v76_v8 = vld [vmem:[%s4534_s0 + $0x1e8] sm:$0xff]  ;;  %v82_v26 = vld [vmem:[%s4534_s0 + $0x218] sm:$0xff]  ;;  %vm1481_vm13 = vcmask 917312   ;;  %vm1485_vm14 = vcmask 982912   ;;  %vm1489_vm15 = vcmask 1048512  }
  0x17   :  { %v455_v14 = vsel %vm271_vm0, %v76_v8, 0.0  ;;  %v80_v16 = vld [vmem:[%s4534_s0 + $0x208] sm:$0xff]  ;;  %s2179_s20 = smov [#allocation2]   ;;  %s2142_s24 = sshll.u32 %s4537_s3, 4  ;;  %s2143_s24 = int_to_ptr.hbm [resolvable:$true] %s2142_s24 }
  0x18   :  { %v84_v44 = vld [vmem:[%s4534_s0 + $0x228] sm:$0xff]  ;;  %s2140_s21 = sshll.u32 %s2179_s20, 4  ;;  %s2141_s21 = int_to_ptr.vmem [resolvable:$true] %s2140_s21 }
  0x1b   :  { %306 = vadd.xlane.f32.xlu2 %v305_v21  ;;  %303 = vadd.xlane.f32.xlu1 %v302_v22  ;;  %v58_v21 = vld [vmem:[%s4534_s0 + $0x158] sm:$0xff]  ;;  %v57_v22 = vld [vmem:[%s4534_s0 + $0x150] sm:$0xff] }
  0x1c   :  { %300 = vadd.xlane.f32.xlu0 %v299_v23  ;;  %v404_v23 = vsel %vm271_vm0, %v59_v20, 0.0  ;;  %v401_v24 = vsel %vm271_vm0, %v58_v21, 0.0  ;;  %v398_v25 = vsel %vm271_vm0, %v57_v22, 0.0  ;;  %v78_v20 = vld [vmem:[%s4534_s0 + $0x1f8] sm:$0xff]  ;;  %v467_v22 = vsel %vm271_vm0, %v80_v16, 0.0 }
  0x1d   :  { %v94_v16 = vld [vmem:[%s4534_s0 + $0x278] sm:$0xff] }
  0x23   :  { %315 = vadd.xlane.f32.xlu2 %v314_v27  ;;  %312 = vadd.xlane.f32.xlu1 %v311_v28  ;;  %v61_v27 = vld [vmem:[%s4534_s0 + $0x170] sm:$0xff] }
  0x24   :  { %309 = vadd.xlane.f32.xlu0 %v308_v29 }
  0x2b   :  { %324 = vadd.xlane.f32.xlu2 %v323_v33  ;;  %321 = vadd.xlane.f32.xlu1 %v320_v34  ;;  %v410_v33 = vsel %vm271_vm0, %v61_v27, 0.0  ;;  %v407_v34 = vsel %vm271_vm0, %v60_v30, 0.0 }
  0x2c   :  { %318 = vadd.xlane.f32.xlu0 %v317_v35  ;;  %v65_v35 = vld [vmem:[%s4534_s0 + $0x190] sm:$0xff] }
  0x33   :  { %333 = vadd.xlane.f32.xlu2 %v332_v39  ;;  %330 = vadd.xlane.f32.xlu1 %v329_v40  ;;  %v63_v39 = vld [vmem:[%s4534_s0 + $0x180] sm:$0xff] }
  0x34   :  { %327 = vadd.xlane.f32.xlu0 %v326_v41  ;;  %v422_v41 = vsel %vm271_vm0, %v65_v35, 0.0  ;;  %v416_v43 = vsel %vm271_vm0, %v63_v39, 0.0  ;;  %v473_v35 = vsel %vm271_vm0, %v82_v26, 0.0  ;;  %v86_v39 = vld [vmem:[%s4534_s0 + $0x238] sm:$0xff] }
  0x3b   :  { %342 = vadd.xlane.f32.xlu2 %v341_v45  ;;  %339 = vadd.xlane.f32.xlu1 %v338_v46  ;;  %v67_v45 = vld [vmem:[%s4534_s0 + $0x1a0] sm:$0xff] }
  0x3c   :  { %336 = vadd.xlane.f32.xlu0 %v335_v47 }
  0x43   :  { %351 = vadd.xlane.f32.xlu2 %v350_v51  ;;  %348 = vadd.xlane.f32.xlu1 %v347_v52  ;;  %v428_v51 = vsel %vm271_vm0, %v67_v45, 0.0  ;;  %v425_v52 = vsel %vm271_vm0, %v66_v48, 0.0  ;;  %v485_v48 = vsel %vm271_vm0, %v86_v39, 0.0  ;;  %v96_v39 = vld [vmem:[%s4534_s0 + $0x288] sm:$0xff] }
  0x44   :  { %345 = vadd.xlane.f32.xlu0 %v344_v53  ;;  %v71_v53 = vld [vmem:[%s4534_s0 + $0x1c0] sm:$0xff] }
  0x4b   :  { %360 = vadd.xlane.f32.xlu2 %v359_v57  ;;  %357 = vadd.xlane.f32.xlu1 %v356_v58  ;;  %v69_v57 = vld [vmem:[%s4534_s0 + $0x1b0] sm:$0xff] }
  0x4c   :  { %354 = vadd.xlane.f32.xlu0 %v353_v59  ;;  %v440_v59 = vsel %vm271_vm0, %v71_v53, 0.0  ;;  %v434_v61 = vsel %vm271_vm0, %v69_v57, 0.0  ;;  %v88_v53 = vld [vmem:[%s4534_s0 + $0x248] sm:$0xff] }
  0x4d   :  { %v491_v62 = vsel %vm271_vm0, %v88_v53, 0.0 }
  0x53   :  { %369 = vadd.xlane.f32.xlu2 %v368_v63  ;;  %366 = vadd.xlane.f32.xlu1 %v365_v0  ;;  %v73_v63 = vld [vmem:[%s4534_s0 + $0x1d0] sm:$0xff] }
  0x54   :  { %363 = vadd.xlane.f32.xlu0 %v362_v1 }
  0x5b   :  { %378 = vadd.xlane.f32.xlu2 %v377_v5  ;;  %375 = vadd.xlane.f32.xlu1 %v374_v6  ;;  %v446_v5 = vsel %vm271_vm0, %v73_v63, 0.0  ;;  %v443_v6 = vsel %vm271_vm0, %v72_v2, 0.0  ;;  %v92_v2 = vld [vmem:[%s4534_s0 + $0x268] sm:$0xff] }
  0x5c   :  { %372 = vadd.xlane.f32.xlu0 %v371_v7  ;;  %v77_v7 = vld [vmem:[%s4534_s0 + $0x1f0] sm:$0xff] }
  0x63   :  { %387 = vadd.xlane.f32.xlu2 %v386_v11  ;;  %384 = vadd.xlane.f32.xlu1 %v383_v12  ;;  %v75_v11 = vld [vmem:[%s4534_s0 + $0x1e0] sm:$0xff] }
  0x64   :  { %381 = vadd.xlane.f32.xlu0 %v380_v13  ;;  %v458_v13 = vsel %vm271_vm0, %v77_v7, 0.0  ;;  %v452_v15 = vsel %vm271_vm0, %v75_v11, 0.0  ;;  %v90_v7 = vld [vmem:[%s4534_s0 + $0x258] sm:$0xff]  ;;  %v503_v11 = vsel %vm271_vm0, %v92_v2, 0.0 }
  0x6b   :  { %396 = vadd.xlane.f32.xlu2 %v395_v17  ;;  %393 = vadd.xlane.f32.xlu1 %v392_v18  ;;  %v79_v17 = vld [vmem:[%s4534_s0 + $0x200] sm:$0xff] }
  0x6c   :  { %390 = vadd.xlane.f32.xlu0 %v389_v19 }
  0x73   :  { %405 = vadd.xlane.f32.xlu2 %v404_v23  ;;  %402 = vadd.xlane.f32.xlu1 %v401_v24  ;;  %v464_v23 = vsel %vm271_vm0, %v79_v17, 0.0  ;;  %v461_v24 = vsel %vm271_vm0, %v78_v20, 0.0 }
  0x74   :  { %399 = vadd.xlane.f32.xlu0 %v398_v25  ;;  %v83_v25 = vld [vmem:[%s4534_s0 + $0x220] sm:$0xff] }
  0x76   :  { %v2386_v28 = vpop.xlane.xlu2 %285  ;;  %v2388_v29 = vpop.xlane.xlu1 %279 }
  0x77   :  { %v2393_v31 = vpop.xlane.xlu0 %273 }
  0x7b   :  { %414 = vadd.xlane.f32.xlu2 %v413_v32  ;;  %411 = vadd.xlane.f32.xlu1 %v410_v33  ;;  %v81_v32 = vld [vmem:[%s4534_s0 + $0x210] sm:$0xff] }
  0x7c   :  { %408 = vadd.xlane.f32.xlu0 %v407_v34  ;;  %v476_v34 = vsel %vm271_vm0, %v83_v25, 0.0  ;;  %v470_v36 = vsel %vm271_vm0, %v81_v32, 0.0  ;;  %v509_v25 = vsel %vm271_vm0, %v94_v16, 0.0  ;;  %v98_v32 = vld [vmem:[%s4534_s0 + $0x298] sm:$0xff] }
  0x7e   :  { %v2404_v37 = vpop.xlane.xlu2 %288  ;;  %v2406_v38 = vpop.xlane.xlu1 %282 }
  0x7f   :  { %v2411_v40 = vpop.xlane.xlu0 %276 }
  0x83   :  { %423 = vadd.xlane.f32.xlu2 %v422_v41  ;;  %420 = vadd.xlane.f32.xlu1 %v419_v42  ;;  %v85_v41 = vld [vmem:[%s4534_s0 + $0x230] sm:$0xff] }
  0x84   :  { %417 = vadd.xlane.f32.xlu0 %v416_v43 }
  0x86   :  { %v2422_v46 = vpop.xlane.xlu2 %297  ;;  %v2424_v47 = vpop.xlane.xlu1 %294 }
  0x87   :  { %v2429_v49 = vpop.xlane.xlu0 %291 }
  0x8b   :  { %432 = vadd.xlane.f32.xlu2 %v431_v50  ;;  %429 = vadd.xlane.f32.xlu1 %v428_v51  ;;  %v482_v50 = vsel %vm271_vm0, %v85_v41, 0.0  ;;  %v479_v51 = vsel %vm271_vm0, %v84_v44, 0.0  ;;  %v521_v44 = vsel %vm271_vm0, %v98_v32, 0.0  ;;  %v106_v32 = vld [vmem:[%s4534_s0 + $0x2d8] sm:$0xff] }
  0x8c   :  { %426 = vadd.xlane.f32.xlu0 %v425_v52  ;;  %v89_v52 = vld [vmem:[%s4534_s0 + $0x250] sm:$0xff] }
  0x8e   :  { %v2440_v55 = vpop.xlane.xlu2 %306  ;;  %v2442_v56 = vpop.xlane.xlu1 %303 }
  0x8f   :  { %v2447_v58 = vpop.xlane.xlu0 %300 }
  0x93   :  { %441 = vadd.xlane.f32.xlu2 %v440_v59  ;;  %438 = vadd.xlane.f32.xlu1 %v437_v60  ;;  %v87_v59 = vld [vmem:[%s4534_s0 + $0x240] sm:$0xff] }
  0x94   :  { %435 = vadd.xlane.f32.xlu0 %v434_v61  ;;  %v494_v61 = vsel %vm271_vm0, %v89_v52, 0.0  ;;  %v488_v63 = vsel %vm271_vm0, %v87_v59, 0.0  ;;  %v100_v52 = vld [vmem:[%s4534_s0 + $0x2a8] sm:$0xff] }
  0x95   :  { %v527_v2 = vsel %vm271_vm0, %v100_v52, 0.0 }
  0x96   :  { %v2458_v0 = vpop.xlane.xlu2 %315  ;;  %v2460_v1 = vpop.xlane.xlu1 %312 }
  0x97   :  { %v2465_v3 = vpop.xlane.xlu0 %309 }
  0x9b   :  { %450 = vadd.xlane.f32.xlu2 %v449_v4  ;;  %447 = vadd.xlane.f32.xlu1 %v446_v5  ;;  %v91_v4 = vld [vmem:[%s4534_s0 + $0x260] sm:$0xff] }
  0x9c   :  { %444 = vadd.xlane.f32.xlu0 %v443_v6 }
  0x9e   :  { %v2476_v9 = vpop.xlane.xlu2 %324  ;;  %v2478_v10 = vpop.xlane.xlu1 %321 }
  0x9f   :  { %v2483_v12 = vpop.xlane.xlu0 %318 }
  0xa3   :  { %459 = vadd.xlane.f32.xlu2 %v458_v13  ;;  %456 = vadd.xlane.f32.xlu1 %v455_v14  ;;  %v500_v13 = vsel %vm271_vm0, %v91_v4, 0.0  ;;  %v497_v14 = vsel %vm271_vm0, %v90_v7, 0.0  ;;  %v104_v7 = vld [vmem:[%s4534_s0 + $0x2c8] sm:$0xff] }
  0xa4   :  { %453 = vadd.xlane.f32.xlu0 %v452_v15  ;;  %v95_v15 = vld [vmem:[%s4534_s0 + $0x280] sm:$0xff] }
  0xa6   :  { %v2494_v18 = vpop.xlane.xlu2 %333  ;;  %v2496_v19 = vpop.xlane.xlu1 %330 }
  0xa7   :  { %v2501_v21 = vpop.xlane.xlu0 %327 }
  0xab   :  { %468 = vadd.xlane.f32.xlu2 %v467_v22  ;;  %465 = vadd.xlane.f32.xlu1 %v464_v23  ;;  %v93_v22 = vld [vmem:[%s4534_s0 + $0x270] sm:$0xff] }
  0xac   :  { %462 = vadd.xlane.f32.xlu0 %v461_v24  ;;  %v512_v24 = vsel %vm271_vm0, %v95_v15, 0.0  ;;  %v506_v26 = vsel %vm271_vm0, %v93_v22, 0.0  ;;  %v102_v15 = vld [vmem:[%s4534_s0 + $0x2b8] sm:$0xff]  ;;  %v539_v22 = vsel %vm271_vm0, %v104_v7, 0.0  ;;  %v108_v7 = vld [vmem:[%s4534_s0 + $0x2e8] sm:$0xff] }
  0xae   :  { %v2512_v27 = vpop.xlane.xlu2 %342  ;;  %v2514_v30 = vpop.xlane.xlu1 %339 }
  0xaf   :  { %v2519_v33 = vpop.xlane.xlu0 %336 }
  0xb3   :  { %477 = vadd.xlane.f32.xlu2 %v476_v34  ;;  %474 = vadd.xlane.f32.xlu1 %v473_v35  ;;  %v97_v34 = vld [vmem:[%s4534_s0 + $0x290] sm:$0xff] }
  0xb4   :  { %471 = vadd.xlane.f32.xlu0 %v470_v36 }
  0xb6   :  { %v2530_v42 = vpop.xlane.xlu2 %351  ;;  %v2532_v43 = vpop.xlane.xlu1 %348 }
  0xb7   :  { %v2537_v45 = vpop.xlane.xlu0 %345 }
  0xbb   :  { %486 = vadd.xlane.f32.xlu2 %v485_v48  ;;  %483 = vadd.xlane.f32.xlu1 %v482_v50  ;;  %v518_v48 = vsel %vm271_vm0, %v97_v34, 0.0  ;;  %v515_v50 = vsel %vm271_vm0, %v96_v39, 0.0 }
  0xbc   :  { %480 = vadd.xlane.f32.xlu0 %v479_v51  ;;  %v101_v51 = vld [vmem:[%s4534_s0 + $0x2b0] sm:$0xff] }
  0xbe   :  { %v2548_v54 = vpop.xlane.xlu2 %360  ;;  %v2550_v57 = vpop.xlane.xlu1 %357 }
  0xbf   :  { %v2555_v60 = vpop.xlane.xlu0 %354 }
  0xc3   :  { %495 = vadd.xlane.f32.xlu2 %v494_v61  ;;  %492 = vadd.xlane.f32.xlu1 %v491_v62  ;;  %v99_v61 = vld [vmem:[%s4534_s0 + $0x2a0] sm:$0xff] }
  0xc4   :  { %489 = vadd.xlane.f32.xlu0 %v488_v63  ;;  %v530_v63 = vsel %vm271_vm0, %v101_v51, 0.0  ;;  %v524_v4 = vsel %vm271_vm0, %v99_v61, 0.0  ;;  %v545_v51 = vsel %vm271_vm0, %v106_v32, 0.0  ;;  %v110_v61 = vld [vmem:[%s4534_s0 + $0x2f8] sm:$0xff] }
  0xc6   :  { %v2566_v5 = vpop.xlane.xlu2 %369  ;;  %v2568_v6 = vpop.xlane.xlu1 %366 }
  0xc7   :  { %4542 = vst [vmem:[#allocation5_spill] sm:$0xff] %v2566_v5  ;;  %v2573_v8 = vpop.xlane.xlu0 %363 }
  0xcb   :  { %504 = vadd.xlane.f32.xlu2 %v503_v11  ;;  %501 = vadd.xlane.f32.xlu1 %v500_v13  ;;  %v103_v11 = vld [vmem:[%s4534_s0 + $0x2c0] sm:$0xff] }
  0xcc   :  { %498 = vadd.xlane.f32.xlu0 %v497_v14 }
  0xce   :  { %v2584_v17 = vpop.xlane.xlu2 %378  ;;  %v2586_v20 = vpop.xlane.xlu1 %375 }
  0xcf   :  { %4543 = vst [vmem:[#allocation6_spill] sm:$0xff] %v2584_v17  ;;  %v2591_v23 = vpop.xlane.xlu0 %372 }
  0xd0   :  { %4544 = vst [vmem:[#allocation7_spill] sm:$0xff] %v2586_v20 }
  0xd1   :  { %4545 = vst [vmem:[#allocation8_spill] sm:$0xff] %v2591_v23 }
  0xd3   :  { %513 = vadd.xlane.f32.xlu2 %v512_v24  ;;  %510 = vadd.xlane.f32.xlu1 %v509_v25  ;;  %v536_v24 = vsel %vm271_vm0, %v103_v11, 0.0  ;;  %v533_v25 = vsel %vm271_vm0, %v102_v15, 0.0  ;;  %v557_v15 = vsel %vm271_vm0, %v110_v61, 0.0 }
  0xd4   :  { %507 = vadd.xlane.f32.xlu0 %v506_v26  ;;  %v107_v26 = vld [vmem:[%s4534_s0 + $0x2e0] sm:$0xff] }
  0xd6   :  { %v2602_v35 = vpop.xlane.xlu2 %387  ;;  %v2604_v36 = vpop.xlane.xlu1 %384 }
  0xd7   :  { %4546 = vst [vmem:[#allocation9_spill] sm:$0xff] %v2602_v35  ;;  %v2609_v41 = vpop.xlane.xlu0 %381 }
  0xd8   :  { %4547 = vst [vmem:[#allocation10_spill] sm:$0xff] %v2604_v36 }
  0xd9   :  { %4548 = vst [vmem:[#allocation11_spill] sm:$0xff] %v2609_v41 }
  0xdb   :  { %522 = vadd.xlane.f32.xlu2 %v521_v44  ;;  %519 = vadd.xlane.f32.xlu1 %v518_v48  ;;  %v105_v44 = vld [vmem:[%s4534_s0 + $0x2d0] sm:$0xff] }
  0xdc   :  { %516 = vadd.xlane.f32.xlu0 %v515_v50  ;;  %v548_v50 = vsel %vm271_vm0, %v107_v26, 0.0  ;;  %v542_v52 = vsel %vm271_vm0, %v105_v44, 0.0  ;;  %v112_v26 = vld [vmem:[%s4534_s0 + $0x308] sm:$0xff] }
  0xdd   :  { %v563_v61 = vsel %vm271_vm0, %v112_v26, 0.0 }
  0xde   :  { %v2620_v53 = vpop.xlane.xlu2 %396  ;;  %v2622_v59 = vpop.xlane.xlu1 %393 }
  0xdf   :  { %4549 = vst [vmem:[#allocation12_spill] sm:$0xff] %v2620_v53  ;;  %v2627_v62 = vpop.xlane.xlu0 %390 }
  0xe0   :  { %4550 = vst [vmem:[#allocation13_spill] sm:$0xff] %v2622_v59 }
  0xe1   :  { %4551 = vst [vmem:[#allocation14_spill] sm:$0xff] %v2627_v62 }
  0xe3   :  { %531 = vadd.xlane.f32.xlu2 %v530_v63  ;;  %528 = vadd.xlane.f32.xlu1 %v527_v2  ;;  %v109_v63 = vld [vmem:[%s4534_s0 + $0x2f0] sm:$0xff] }
  0xe4   :  { %525 = vadd.xlane.f32.xlu0 %v524_v4 }
  0xe6   :  { %v2638_v13 = vpop.xlane.xlu2 %405  ;;  %v2640_v14 = vpop.xlane.xlu1 %402 }
  0xe7   :  { %4552 = vst [vmem:[#allocation15_spill] sm:$0xff] %v2638_v13  ;;  %v2645_v16 = vpop.xlane.xlu0 %399 }
  0xe8   :  { %4553 = vst [vmem:[#allocation16_spill] sm:$0xff] %v2640_v14 }
  0xe9   :  { %4554 = vst [vmem:[#allocation17_spill] sm:$0xff] %v2645_v16 }
  0xeb   :  { %540 = vadd.xlane.f32.xlu2 %v539_v22  ;;  %537 = vadd.xlane.f32.xlu1 %v536_v24  ;;  %v554_v22 = vsel %vm271_vm0, %v109_v63, 0.0  ;;  %v551_v24 = vsel %vm271_vm0, %v108_v7, 0.0  ;;  %v116_v7 = vld [vmem:[%s4534_s0 + $0x328] sm:$0xff] }
  0xec   :  { %534 = vadd.xlane.f32.xlu0 %v533_v25  ;;  %v113_v25 = vld [vmem:[%s4534_s0 + $0x310] sm:$0xff] }
  0xee   :  { %v2656_v34 = vpop.xlane.xlu2 %414  ;;  %v2658_v39 = vpop.xlane.xlu1 %411 }
  0xef   :  { %4555 = vst [vmem:[#allocation18_spill] sm:$0xff] %v2656_v34  ;;  %v2663_v48 = vpop.xlane.xlu0 %408 }
  0xf0   :  { %4556 = vst [vmem:[#allocation19_spill] sm:$0xff] %v2658_v39 }
  0xf1   :  { %4557 = vst [vmem:[#allocation20_spill] sm:$0xff] %v2663_v48 }
  0xf3   :  { %549 = vadd.xlane.f32.xlu2 %v548_v50  ;;  %546 = vadd.xlane.f32.xlu1 %v545_v51  ;;  %v111_v50 = vld [vmem:[%s4534_s0 + $0x300] sm:$0xff] }
  0xf4   :  { %543 = vadd.xlane.f32.xlu0 %v542_v52  ;;  %v566_v52 = vsel %vm271_vm0, %v113_v25, 0.0  ;;  %v560_v63 = vsel %vm271_vm0, %v111_v50, 0.0  ;;  %v114_v25 = vld [vmem:[%s4534_s0 + $0x318] sm:$0xff]  ;;  %v575_v50 = vsel %vm271_vm0, %v116_v7, 0.0  ;;  %v117_v7 = vld [vmem:[%s4534_s0 + $0x330] sm:$0xff] }
  0xf6   :  { %v2674_v2 = vpop.xlane.xlu2 %423  ;;  %v2676_v4 = vpop.xlane.xlu1 %420 }
  0xf7   :  { %4558 = vst [vmem:[#allocation21_spill] sm:$0xff] %v2674_v2  ;;  %v2681_v11 = vpop.xlane.xlu0 %417 }
  0xf8   :  { %4559 = vst [vmem:[#allocation22_spill] sm:$0xff] %v2676_v4 }
  0xf9   :  { %4560 = vst [vmem:[#allocation23_spill] sm:$0xff] %v2681_v11 }
  0xfb   :  { %558 = vadd.xlane.f32.xlu2 %v557_v15  ;;  %555 = vadd.xlane.f32.xlu1 %v554_v22  ;;  %v115_v15 = vld [vmem:[%s4534_s0 + $0x320] sm:$0xff] }
  0xfc   :  { %552 = vadd.xlane.f32.xlu0 %v551_v24 }
  0xfe   :  { %v2692_v32 = vpop.xlane.xlu2 %432  ;;  %v2694_v44 = vpop.xlane.xlu1 %429 }
  0xff   :  { %4561 = vst [vmem:[#allocation24_spill] sm:$0xff] %v2692_v32  ;;  %v2699_v51 = vpop.xlane.xlu0 %426 }
 0x100   :  { %4562 = vst [vmem:[#allocation25_spill] sm:$0xff] %v2694_v44 }
 0x101   :  { %4563 = vst [vmem:[#allocation26_spill] sm:$0xff] %v2699_v51 }
 0x103   :  { %567 = vadd.xlane.f32.xlu2 %v566_v52  ;;  %564 = vadd.xlane.f32.xlu1 %v563_v61  ;;  %v572_v52 = vsel %vm271_vm0, %v115_v15, 0.0  ;;  %v569_v61 = vsel %vm271_vm0, %v114_v25, 0.0 }
 0x104   :  { %561 = vadd.xlane.f32.xlu0 %v560_v63  ;;  %v119_v63 = vld [vmem:[%s4534_s0 + $0x340] sm:$0xff] }
 0x105   :  { %v584_v25 = vsel %vm271_vm0, %v119_v63, 0.0 }
 0x106   :  { %v2710_v22 = vpop.xlane.xlu2 %441  ;;  %v2712_v24 = vpop.xlane.xlu1 %438 }
 0x107   :  { %4564 = vst [vmem:[#allocation27_spill] sm:$0xff] %v2710_v22  ;;  %v2717_v26 = vpop.xlane.xlu0 %435  ;;  %v118_v22 = vld [vmem:[%s4534_s0 + $0x338] sm:$0xff] }
 0x108   :  { %4565 = vst [vmem:[#allocation28_spill] sm:$0xff] %v2712_v24 }
 0x109   :  { %4566 = vst [vmem:[#allocation29_spill] sm:$0xff] %v2717_v26 }
 0x10b   :  { %576 = vadd.xlane.f32.xlu2 %v575_v50  ;;  %573 = vadd.xlane.f32.xlu1 %v572_v52  ;;  %v581_v50 = vsel %vm271_vm0, %v118_v22, 0.0  ;;  %v578_v52 = vsel %vm271_vm0, %v117_v7, 0.0  ;;  %v120_v22 = vld [vmem:[%s4534_s0 + $0x348] sm:$0xff] }
 0x10c   :  { %570 = vadd.xlane.f32.xlu0 %v569_v61  ;;  %v122_v61 = vld [vmem:[%s4534_s0 + $0x358] sm:$0xff] }
 0x10d   :  { %v593_v7 = vsel %vm271_vm0, %v122_v61, 0.0 }
 0x10e   :  { %v2728_v24 = vpop.xlane.xlu2 %450  ;;  %v2730_v26 = vpop.xlane.xlu1 %447 }
 0x10f   :  { %4567 = vst [vmem:[#allocation30_spill] sm:$0xff] %v2728_v24  ;;  %v2735_v15 = vpop.xlane.xlu0 %444  ;;  %v121_v24 = vld [vmem:[%s4534_s0 + $0x350] sm:$0xff] }
 0x110   :  { %4568 = vst [vmem:[#allocation31_spill] sm:$0xff] %v2730_v26 }
 0x111   :  { %4569 = vst [vmem:[#allocation32_spill] sm:$0xff] %v2735_v15 }
 0x113   :  { %585 = vadd.xlane.f32.xlu2 %v584_v25  ;;  %582 = vadd.xlane.f32.xlu1 %v581_v50  ;;  %v590_v25 = vsel %vm271_vm0, %v121_v24, 0.0  ;;  %v587_v50 = vsel %vm271_vm0, %v120_v22, 0.0  ;;  %v123_v24 = vld [vmem:[%s4534_s0 + $0x360] sm:$0xff] }
 0x114   :  { %579 = vadd.xlane.f32.xlu0 %v578_v52  ;;  %v125_v52 = vld [vmem:[%s4534_s0 + $0x370] sm:$0xff] }
 0x115   :  { %v602_v22 = vsel %vm271_vm0, %v125_v52, 0.0 }
 0x116   :  { %v2746_v26 = vpop.xlane.xlu2 %459  ;;  %v2748_v15 = vpop.xlane.xlu1 %456 }
 0x117   :  { %4570 = vst [vmem:[#allocation33_spill] sm:$0xff] %v2746_v26  ;;  %v2753_v63 = vpop.xlane.xlu0 %453  ;;  %v124_v26 = vld [vmem:[%s4534_s0 + $0x368] sm:$0xff] }
 0x118   :  { %4571 = vst [vmem:[#allocation34_spill] sm:$0xff] %v2748_v15 }
 0x119   :  { %4572 = vst [vmem:[#allocation35_spill] sm:$0xff] %v2753_v63 }
 0x11b   :  { %594 = vadd.xlane.f32.xlu2 %v593_v7  ;;  %591 = vadd.xlane.f32.xlu1 %v590_v25  ;;  %v599_v7 = vsel %vm271_vm0, %v124_v26, 0.0  ;;  %v596_v25 = vsel %vm271_vm0, %v123_v24, 0.0  ;;  %v126_v26 = vld [vmem:[%s4534_s0 + $0x378] sm:$0xff] }
 0x11c   :  { %588 = vadd.xlane.f32.xlu0 %v587_v50  ;;  %v128_v50 = vld [vmem:[%s4534_s0 + $0x388] sm:$0xff] }
 0x11d   :  { %v611_v24 = vsel %vm271_vm0, %v128_v50, 0.0 }
 0x11e   :  { %v2764_v15 = vpop.xlane.xlu2 %468  ;;  %v2766_v63 = vpop.xlane.xlu1 %465 }
 0x11f   :  { %4573 = vst [vmem:[#allocation36_spill] sm:$0xff] %v2764_v15  ;;  %v2771_v61 = vpop.xlane.xlu0 %462 }
 0x120   :  { %4574 = vst [vmem:[#allocation37_spill] sm:$0xff] %v2766_v63  ;;  %v127_v63 = vld [vmem:[%s4534_s0 + $0x380] sm:$0xff] }
 0x121   :  { %4575 = vst [vmem:[#allocation38_spill] sm:$0xff] %v2771_v61 }
 0x123   :  { %603 = vadd.xlane.f32.xlu2 %v602_v22  ;;  %600 = vadd.xlane.f32.xlu1 %v599_v7  ;;  %v608_v22 = vsel %vm271_vm0, %v127_v63, 0.0  ;;  %v605_v7 = vsel %vm271_vm0, %v126_v26, 0.0  ;;  %v129_v63 = vld [vmem:[%s4534_s0 + $0x390] sm:$0xff] }
 0x124   :  { %597 = vadd.xlane.f32.xlu0 %v596_v25  ;;  %v131_v25 = vld [vmem:[%s4534_s0 + $0x3a0] sm:$0xff] }
 0x125   :  { %v620_v26 = vsel %vm271_vm0, %v131_v25, 0.0 }
 0x126   :  { %v2782_v15 = vpop.xlane.xlu2 %477  ;;  %v2784_v61 = vpop.xlane.xlu1 %474 }
 0x127   :  { %4576 = vst [vmem:[#allocation39_spill] sm:$0xff] %v2782_v15  ;;  %v2789_v52 = vpop.xlane.xlu0 %471  ;;  %v130_v15 = vld [vmem:[%s4534_s0 + $0x398] sm:$0xff] }
 0x128   :  { %4577 = vst [vmem:[#allocation40_spill] sm:$0xff] %v2784_v61 }
 0x129   :  { %4578 = vst [vmem:[#allocation41_spill] sm:$0xff] %v2789_v52 }
 0x12b   :  { %612 = vadd.xlane.f32.xlu2 %v611_v24  ;;  %609 = vadd.xlane.f32.xlu1 %v608_v22  ;;  %v617_v24 = vsel %vm271_vm0, %v130_v15, 0.0  ;;  %v614_v22 = vsel %vm271_vm0, %v129_v63, 0.0  ;;  %v132_v15 = vld [vmem:[%s4534_s0 + $0x3a8] sm:$0xff] }
 0x12c   :  { %606 = vadd.xlane.f32.xlu0 %v605_v7  ;;  %v134_v7 = vld [vmem:[%s4534_s0 + $0x3b8] sm:$0xff] }
 0x12d   :  { %v629_v63 = vsel %vm271_vm0, %v134_v7, 0.0 }
 0x12e   :  { %v2800_v61 = vpop.xlane.xlu2 %486  ;;  %v2802_v52 = vpop.xlane.xlu1 %483 }
 0x12f   :  { %4579 = vst [vmem:[#allocation42_spill] sm:$0xff] %v2800_v61  ;;  %v2807_v50 = vpop.xlane.xlu0 %480  ;;  %v133_v61 = vld [vmem:[%s4534_s0 + $0x3b0] sm:$0xff] }
 0x130   :  { %4580 = vst [vmem:[#allocation43_spill] sm:$0xff] %v2802_v52 }
 0x131   :  { %4581 = vst [vmem:[#allocation44_spill] sm:$0xff] %v2807_v50 }
 0x133   :  { %621 = vadd.xlane.f32.xlu2 %v620_v26  ;;  %618 = vadd.xlane.f32.xlu1 %v617_v24  ;;  %v626_v26 = vsel %vm271_vm0, %v133_v61, 0.0  ;;  %v623_v24 = vsel %vm271_vm0, %v132_v15, 0.0  ;;  %v135_v61 = vld [vmem:[%s4534_s0 + $0x3c0] sm:$0xff] }
 0x134   :  { %615 = vadd.xlane.f32.xlu0 %v614_v22  ;;  %v137_v22 = vld [vmem:[%s4534_s0 + $0x3d0] sm:$0xff] }
 0x135   :  { %v638_v15 = vsel %vm271_vm0, %v137_v22, 0.0 }
 0x136   :  { %v2818_v52 = vpop.xlane.xlu2 %495  ;;  %v2820_v50 = vpop.xlane.xlu1 %492 }
 0x137   :  { %4582 = vst [vmem:[#allocation45_spill] sm:$0xff] %v2818_v52  ;;  %v2825_v25 = vpop.xlane.xlu0 %489  ;;  %v136_v52 = vld [vmem:[%s4534_s0 + $0x3c8] sm:$0xff] }
 0x138   :  { %4583 = vst [vmem:[#allocation46_spill] sm:$0xff] %v2820_v50 }
 0x139   :  { %4584 = vst [vmem:[#allocation47_spill] sm:$0xff] %v2825_v25 }
 0x13b   :  { %630 = vadd.xlane.f32.xlu2 %v629_v63  ;;  %627 = vadd.xlane.f32.xlu1 %v626_v26  ;;  %v635_v63 = vsel %vm271_vm0, %v136_v52, 0.0  ;;  %v632_v26 = vsel %vm271_vm0, %v135_v61, 0.0  ;;  %v138_v52 = vld [vmem:[%s4534_s0 + $0x3d8] sm:$0xff] }
 0x13c   :  { %624 = vadd.xlane.f32.xlu0 %v623_v24  ;;  %v140_v24 = vld [vmem:[%s4534_s0 + $0x3e8] sm:$0xff] }
 0x13d   :  { %v647_v61 = vsel %vm271_vm0, %v140_v24, 0.0 }
 0x13e   :  { %v2836_v50 = vpop.xlane.xlu2 %504  ;;  %v2838_v25 = vpop.xlane.xlu1 %501 }
 0x13f   :  { %4585 = vst [vmem:[#allocation48_spill] sm:$0xff] %v2836_v50  ;;  %v2843_v7 = vpop.xlane.xlu0 %498  ;;  %v139_v50 = vld [vmem:[%s4534_s0 + $0x3e0] sm:$0xff] }
 0x140   :  { %4586 = vst [vmem:[#allocation49_spill] sm:$0xff] %v2838_v25 }
 0x141   :  { %4587 = vst [vmem:[#allocation50_spill] sm:$0xff] %v2843_v7 }
 0x143   :  { %639 = vadd.xlane.f32.xlu2 %v638_v15  ;;  %636 = vadd.xlane.f32.xlu1 %v635_v63  ;;  %v644_v15 = vsel %vm271_vm0, %v139_v50, 0.0  ;;  %v641_v63 = vsel %vm271_vm0, %v138_v52, 0.0  ;;  %v141_v50 = vld [vmem:[%s4534_s0 + $0x3f0] sm:$0xff] }
 0x144   :  { %633 = vadd.xlane.f32.xlu0 %v632_v26  ;;  %v143_v26 = vld [vmem:[%s4534_s0 + $0x400] sm:$0xff] }
 0x145   :  { %v656_v52 = vsel %vm271_vm0, %v143_v26, 0.0 }
 0x146   :  { %v2854_v25 = vpop.xlane.xlu2 %513  ;;  %v2856_v7 = vpop.xlane.xlu1 %510 }
 0x147   :  { %4588 = vst [vmem:[#allocation51_spill] sm:$0xff] %v2854_v25  ;;  %v2861_v22 = vpop.xlane.xlu0 %507 }
 0x148   :  { %4589 = vst [vmem:[#allocation52_spill] sm:$0xff] %v2856_v7  ;;  %v142_v7 = vld [vmem:[%s4534_s0 + $0x3f8] sm:$0xff] }
 0x149   :  { %4590 = vst [vmem:[#allocation53_spill] sm:$0xff] %v2861_v22 }
 0x14b   :  { %648 = vadd.xlane.f32.xlu2 %v647_v61  ;;  %645 = vadd.xlane.f32.xlu1 %v644_v15  ;;  %v653_v61 = vsel %vm271_vm0, %v142_v7, 0.0  ;;  %v650_v15 = vsel %vm271_vm0, %v141_v50, 0.0  ;;  %v144_v7 = vld [vmem:[%s4534_s0 + $0x408] sm:$0xff] }
 0x14c   :  { %642 = vadd.xlane.f32.xlu0 %v641_v63  ;;  %v146_v63 = vld [vmem:[%s4534_s0 + $0x418] sm:$0xff] }
 0x14d   :  { %v665_v50 = vsel %vm271_vm0, %v146_v63, 0.0 }
 0x14e   :  { %v2872_v25 = vpop.xlane.xlu2 %522  ;;  %v2874_v22 = vpop.xlane.xlu1 %519 }
 0x14f   :  { %4591 = vst [vmem:[#allocation54_spill] sm:$0xff] %v2872_v25  ;;  %v2879_v24 = vpop.xlane.xlu0 %516  ;;  %v145_v25 = vld [vmem:[%s4534_s0 + $0x410] sm:$0xff] }
 0x150   :  { %4592 = vst [vmem:[#allocation55_spill] sm:$0xff] %v2874_v22 }
 0x151   :  { %4593 = vst [vmem:[#allocation56_spill] sm:$0xff] %v2879_v24 }
 0x153   :  { %657 = vadd.xlane.f32.xlu2 %v656_v52  ;;  %654 = vadd.xlane.f32.xlu1 %v653_v61  ;;  %v662_v52 = vsel %vm271_vm0, %v145_v25, 0.0  ;;  %v659_v61 = vsel %vm271_vm0, %v144_v7, 0.0  ;;  %v147_v25 = vld [vmem:[%s4534_s0 + $0x420] sm:$0xff] }
 0x154   :  { %651 = vadd.xlane.f32.xlu0 %v650_v15  ;;  %v149_v15 = vld [vmem:[%s4534_s0 + $0x430] sm:$0xff] }
 0x155   :  { %v674_v7 = vsel %vm271_vm0, %v149_v15, 0.0 }
 0x156   :  { %v2890_v22 = vpop.xlane.xlu2 %531  ;;  %v2892_v24 = vpop.xlane.xlu1 %528 }
 0x157   :  { %4594 = vst [vmem:[#allocation57_spill] sm:$0xff] %v2890_v22  ;;  %v2897_v26 = vpop.xlane.xlu0 %525  ;;  %v148_v22 = vld [vmem:[%s4534_s0 + $0x428] sm:$0xff] }
 0x158   :  { %4595 = vst [vmem:[#allocation58_spill] sm:$0xff] %v2892_v24 }
 0x159   :  { %4596 = vst [vmem:[#allocation59_spill] sm:$0xff] %v2897_v26 }
 0x15b   :  { %666 = vadd.xlane.f32.xlu2 %v665_v50  ;;  %663 = vadd.xlane.f32.xlu1 %v662_v52  ;;  %v671_v50 = vsel %vm271_vm0, %v148_v22, 0.0  ;;  %v668_v52 = vsel %vm271_vm0, %v147_v25, 0.0  ;;  %v150_v22 = vld [vmem:[%s4534_s0 + $0x438] sm:$0xff] }
 0x15c   :  { %660 = vadd.xlane.f32.xlu0 %v659_v61  ;;  %v152_v61 = vld [vmem:[%s4534_s0 + $0x448] sm:$0xff] }
 0x15d   :  { %v683_v25 = vsel %vm271_vm0, %v152_v61, 0.0 }
 0x15e   :  { %v2908_v24 = vpop.xlane.xlu2 %540  ;;  %v2910_v26 = vpop.xlane.xlu1 %537 }
 0x15f   :  { %4597 = vst [vmem:[#allocation60_spill] sm:$0xff] %v2908_v24  ;;  %v2915_v63 = vpop.xlane.xlu0 %534  ;;  %v151_v24 = vld [vmem:[%s4534_s0 + $0x440] sm:$0xff] }
 0x160   :  { %4598 = vst [vmem:[#allocation61_spill] sm:$0xff] %v2910_v26 }
 0x161   :  { %4599 = vst [vmem:[#allocation62_spill] sm:$0xff] %v2915_v63 }
 0x163   :  { %675 = vadd.xlane.f32.xlu2 %v674_v7  ;;  %672 = vadd.xlane.f32.xlu1 %v671_v50  ;;  %v680_v7 = vsel %vm271_vm0, %v151_v24, 0.0  ;;  %v677_v50 = vsel %vm271_vm0, %v150_v22, 0.0  ;;  %v153_v24 = vld [vmem:[%s4534_s0 + $0x450] sm:$0xff] }
 0x164   :  { %669 = vadd.xlane.f32.xlu0 %v668_v52  ;;  %v155_v52 = vld [vmem:[%s4534_s0 + $0x460] sm:$0xff] }
 0x165   :  { %v692_v22 = vsel %vm271_vm0, %v155_v52, 0.0 }
 0x166   :  { %v2926_v26 = vpop.xlane.xlu2 %549  ;;  %v2928_v63 = vpop.xlane.xlu1 %546 }
 0x167   :  { %4600 = vst [vmem:[#allocation63_spill] sm:$0xff] %v2926_v26  ;;  %v2933_v15 = vpop.xlane.xlu0 %543  ;;  %v154_v26 = vld [vmem:[%s4534_s0 + $0x458] sm:$0xff] }
 0x168   :  { %4601 = vst [vmem:[#allocation64_spill] sm:$0xff] %v2928_v63 }
 0x169   :  { %4602 = vst [vmem:[#allocation65_spill] sm:$0xff] %v2933_v15 }
 0x16b   :  { %684 = vadd.xlane.f32.xlu2 %v683_v25  ;;  %681 = vadd.xlane.f32.xlu1 %v680_v7  ;;  %v689_v25 = vsel %vm271_vm0, %v154_v26, 0.0  ;;  %v686_v7 = vsel %vm271_vm0, %v153_v24, 0.0  ;;  %v156_v26 = vld [vmem:[%s4534_s0 + $0x468] sm:$0xff] }
 0x16c   :  { %678 = vadd.xlane.f32.xlu0 %v677_v50  ;;  %v1428_v50 = vlaneseq }
 0x16e   :  { %v2944_v63 = vpop.xlane.xlu2 %558  ;;  %v2946_v15 = vpop.xlane.xlu1 %555 }
 0x16f   :  { %4603 = vst [vmem:[#allocation66_spill] sm:$0xff] %v2944_v63  ;;  %v2951_v61 = vpop.xlane.xlu0 %552  ;;  %v158_v63 = vld [vmem:[%s4534_s0 + $0x478] sm:$0xff] }
 0x170   :  { %4604 = vst [vmem:[#allocation67_spill] sm:$0xff] %v2946_v15  ;;  %v157_v15 = vld [vmem:[%s4534_s0 + $0x470] sm:$0xff]  ;;  %v701_v24 = vsel %vm271_vm0, %v158_v63, 0.0 }
 0x171   :  { %4605 = vst [vmem:[#allocation68_spill] sm:$0xff] %v2951_v61  ;;  %v161_v63 = vld [vmem:[%s4534_s0 + $0x490] sm:$0xff] }
 0x173   :  { %693 = vadd.xlane.f32.xlu2 %v692_v22  ;;  %690 = vadd.xlane.f32.xlu1 %v689_v25  ;;  %v698_v22 = vsel %vm271_vm0, %v157_v15, 0.0  ;;  %v2967_v25 = vand.u32 127, %v1428_v50  ;;  %v160_v15 = vld [vmem:[%s4534_s0 + $0x488] sm:$0xff] }
 0x174   :  { %687 = vadd.xlane.f32.xlu0 %v686_v7  ;;  %v695_v7 = vsel %vm271_vm0, %v156_v26, 0.0  ;;  %v707_v4 = vsel %vm271_vm0, %v160_v15, 0.0  ;;  %v163_v15 = vld [vmem:[%s4534_s0 + $0x4a0] sm:$0xff] }
 0x175   :  { %v2971_v44 = vadd.s32 4294967288, %v2967_v25  ;;  %v2982_v50 = vadd.s32 4294967280, %v2967_v25  ;;  %v2997_v13 = vadd.s32 4294967264, %v2967_v25  ;;  %v3023_v16 = vadd.s32 4294967240, %v2967_v25 }
 0x176   :  { %v568_v32 = vpop.xlane.xlu2 %567  ;;  %v565_v61 = vpop.xlane.xlu1 %564 }
 0x177   :  { %v562_v52 = vpop.xlane.xlu0 %561  ;;  %v1647_v51 = vperm.slane %v565_v61, %v2971_v44  ;;  %v2988_v61 = vadd.s32 4294967272, %v2967_v25 }
 0x178   :  { %v1646_v2 = vperm.slane %v562_v52, %v2967_v25 }
 0x17a   :  { %v1648_v34 = vsel %vm1433_vm1, %v1647_v51, %v1646_v2  ;;  %v164_v51 = vld [vmem:[%s4534_s0 + $0x4a8] sm:$0xff] }
 0x17b   :  { %702 = vadd.xlane.f32.xlu2 %v701_v24  ;;  %699 = vadd.xlane.f32.xlu1 %v698_v22  ;;  %v159_v24 = vld [vmem:[%s4534_s0 + $0x480] sm:$0xff]  ;;  %v1649_v22 = vperm.slane %v568_v32, %v2982_v50 }
 0x17c   :  { %696 = vadd.xlane.f32.xlu0 %v695_v7  ;;  %v710_v7 = vsel %vm271_vm0, %v161_v63, 0.0  ;;  %v704_v48 = vsel %vm271_vm0, %v159_v24, 0.0  ;;  %v3002_v63 = vadd.s32 4294967256, %v2967_v25 }
 0x17d   :  { %v1650_v32 = vsel %vm1437_vm2, %v1649_v22, %v1648_v34  ;;  %v162_v34 = vld [vmem:[%s4534_s0 + $0x498] sm:$0xff] }
 0x17e   :  { %v577_v26 = vpop.xlane.xlu2 %576  ;;  %v574_v11 = vpop.xlane.xlu1 %573  ;;  %v713_v53 = vsel %vm271_vm0, %v162_v34, 0.0 }
 0x17f   :  { %v571_v52 = vpop.xlane.xlu0 %570  ;;  %v1653_v14 = vperm.slane %v574_v11, %v2997_v13 }
 0x180   :  { %v1651_v39 = vperm.slane %v571_v52, %v2988_v61 }
 0x182   :  { %v1652_v2 = vsel %vm1441_vm3, %v1651_v39, %v1650_v32  ;;  %v1655_v39 = vperm.slane %v577_v26, %v3002_v63  ;;  %v716_v32 = vsel %vm271_vm0, %v163_v15, 0.0  ;;  %v166_v15 = vld [vmem:[%s4534_s0 + $0x4b8] sm:$0xff] }
 0x183   :  { %711 = vadd.xlane.f32.xlu2 %v710_v7  ;;  %708 = vadd.xlane.f32.xlu1 %v707_v4  ;;  %v3012_v4 = vadd.s32 4294967248, %v2967_v25  ;;  %v1654_v52 = vsel %vm1445_vm4, %v1653_v14, %v1652_v2  ;;  %v719_v7 = vsel %vm271_vm0, %v164_v51, 0.0  ;;  %v3029_v14 = vadd.s32 4294967232, %v2967_v25  ;;  %v167_v51 = vld [vmem:[%s4534_s0 + $0x4c0] sm:$0xff] }
 0x184   :  { %705 = vadd.xlane.f32.xlu0 %v704_v48  ;;  %v1656_v26 = vsel %vm1449_vm5, %v1655_v39, %v1654_v52  ;;  %v725_v62 = vsel %vm271_vm0, %v166_v15, 0.0 }
 0x186   :  { %v586_v11 = vpop.xlane.xlu2 %585  ;;  %v583_v24 = vpop.xlane.xlu1 %582 }
 0x187   :  { %v580_v48 = vpop.xlane.xlu0 %579  ;;  %v1659_v59 = vperm.slane %v583_v24, %v3023_v16  ;;  %v3039_v24 = vadd.s32 4294967224, %v2967_v25  ;;  %v1661_v34 = vperm.slane %v586_v11, %v3029_v14 }
 0x188   :  { %v1657_v22 = vperm.slane %v580_v48, %v3012_v4 }
 0x18a   :  { %v1658_v2 = vsel %vm1453_vm6, %v1657_v22, %v1656_v26  ;;  %v728_v26 = vsel %vm271_vm0, %v167_v51, 0.0  ;;  %v3060_v51 = vadd.s32 4294967192, %v2967_v25 }
 0x18b   :  { %720 = vadd.xlane.f32.xlu2 %v719_v7  ;;  %717 = vadd.xlane.f32.xlu1 %v716_v32  ;;  %v1660_v52 = vsel %vm1457_vm7, %v1659_v59, %v1658_v2  ;;  %v3047_v7 = vadd.s32 4294967216, %v2967_v25  ;;  %v3056_v59 = vadd.s32 4294967208, %v2967_v25 }
 0x18c   :  { %714 = vadd.xlane.f32.xlu0 %v713_v53  ;;  %v165_v53 = vld [vmem:[%s4534_s0 + $0x4b0] sm:$0xff]  ;;  %v1662_v36 = vsel %vm4541_vm8, %v1661_v34, %v1660_v52 }
 0x18d   :  { %v722_v11 = vsel %vm271_vm0, %v165_v53, 0.0  ;;  %v169_v34 = vld [vmem:[%s4534_s0 + $0x4d0] sm:$0xff]  ;;  %v3070_v53 = vadd.s32 4294967184, %v2967_v25 }
 0x18e   :  { %v595_v39 = vpop.xlane.xlu2 %594  ;;  %v592_v48 = vpop.xlane.xlu1 %591  ;;  %v734_v20 = vsel %vm271_vm0, %v169_v34, 0.0  ;;  %v3096_v34 = vadd.s32 4294967176, %v2967_v25 }
 0x18f   :  { %v589_v22 = vpop.xlane.xlu0 %588  ;;  %v1665_v35 = vperm.slane %v592_v48, %v3047_v7  ;;  %v1667_v15 = vperm.slane %v595_v39, %v3056_v59  ;;  %v170_v48 = vld [vmem:[%s4534_s0 + $0x4d8] sm:$0xff]  ;;  %v168_v39 = vld [vmem:[%s4534_s0 + $0x4c8] sm:$0xff] }
 0x190   :  { %v1663_v32 = vperm.slane %v589_v22, %v3039_v24  ;;  %v737_v17 = vsel %vm271_vm0, %v170_v48, 0.0  ;;  %v173_v48 = vld [vmem:[%s4534_s0 + $0x4f0] sm:$0xff] }
 0x192   :  { %v1664_v2 = vsel %vm4539_vm9, %v1663_v32, %v1662_v36  ;;  %v3073_v36 = vadd.s32 4294967200, %v2967_v25 }
 0x193   :  { %729 = vadd.xlane.f32.xlu2 %v728_v26  ;;  %726 = vadd.xlane.f32.xlu1 %v725_v62  ;;  %v1666_v62 = vsel %vm4540_vm10, %v1665_v35, %v1664_v2  ;;  %v731_v2 = vsel %vm271_vm0, %v168_v39, 0.0 }
 0x194   :  { %723 = vadd.xlane.f32.xlu0 %v722_v11  ;;  %v1668_v35 = vsel %vm4538_vm11, %v1667_v15, %v1666_v62  ;;  %v172_v15 = vld [vmem:[%s4534_s0 + $0x4e8] sm:$0xff] }
 0x196   :  { %v604_v52 = vpop.xlane.xlu2 %603  ;;  %v601_v22 = vpop.xlane.xlu1 %600 }
 0x197   :  { %v1671_v32 = vperm.slane %v601_v22, %v3060_v51  ;;  %v598_v26 = vpop.xlane.xlu0 %597  ;;  %v1673_v11 = vperm.slane %v604_v52, %v3070_v53 }
 0x198   :  { %v1669_v41 = vperm.slane %v598_v26, %v3073_v36  ;;  %v746_v26 = vsel %vm271_vm0, %v173_v48, 0.0  ;;  %v175_v48 = vld [vmem:[%s4534_s0 + $0x500] sm:$0xff] }
 0x19a   :  { %v1670_v23 = vsel %vm1477_vm12, %v1669_v41, %v1668_v35 }
 0x19b   :  { %738 = vadd.xlane.f32.xlu2 %v737_v17  ;;  %735 = vadd.xlane.f32.xlu1 %v734_v20  ;;  %v1672_v22 = vsel %vm1481_vm13, %v1671_v32, %v1670_v23  ;;  %v171_v20 = vld [vmem:[%s4534_s0 + $0x4e0] sm:$0xff] }
 0x19c   :  { %732 = vadd.xlane.f32.xlu0 %v731_v2  ;;  %v1674_v52 = vsel %vm1485_vm14, %v1673_v11, %v1672_v22  ;;  %v743_v11 = vsel %vm271_vm0, %v172_v15, 0.0  ;;  %v740_v2 = vsel %vm271_vm0, %v171_v20, 0.0  ;;  %v174_v20 = vld [vmem:[%s4534_s0 + $0x4f8] sm:$0xff] }
 0x19e   :  { %v613_v41 = vpop.xlane.xlu2 %612  ;;  %v610_v17 = vpop.xlane.xlu1 %609 }
 0x19f   :  { %v1678_v23 = vperm.slane %v613_v41, %v2971_v44  ;;  %v1677_v62 = vperm.slane %v610_v17, %v2967_v25  ;;  %v607_v39 = vpop.xlane.xlu0 %606  ;;  %v176_v41 = vld [vmem:[%s4534_s0 + $0x508] sm:$0xff] }
 0x1a0   :  { %v1675_v32 = vperm.slane %v607_v39, %v3096_v34 }
 0x1a1   :  { %v1679_v35 = vsel %vm1433_vm1, %v1678_v23, %v1677_v62 }
 0x1a2   :  { %v3109_v22 = vsel %vm1489_vm15, %v1675_v32, %v1674_v52  ;;  %v755_v32 = vsel %vm271_vm0, %v176_v41, 0.0  ;;  %v178_v41 = vld [vmem:[%s4534_s0 + $0x518] sm:$0xff] }
 0x1a3   :  { %4606 = vst [vmem:[#allocation69_spill] sm:$0xff] %v3109_v22  ;;  %747 = vadd.xlane.f32.xlu2 %v746_v26  ;;  %744 = vadd.xlane.f32.xlu1 %v743_v11  ;;  %v752_v26 = vsel %vm271_vm0, %v175_v48, 0.0  ;;  %v749_v11 = vsel %vm271_vm0, %v174_v20, 0.0 }
 0x1a4   :  { %741 = vadd.xlane.f32.xlu0 %v740_v2 }
 0x1a6   :  { %v622_v15 = vpop.xlane.xlu2 %621  ;;  %v619_v17 = vpop.xlane.xlu1 %618 }
 0x1a7   :  { %v1682_v52 = vperm.slane %v619_v17, %v2988_v61  ;;  %v616_v23 = vpop.xlane.xlu0 %615  ;;  %v1684_v62 = vperm.slane %v622_v15, %v2997_v13  ;;  %v179_v15 = vld [vmem:[%s4534_s0 + $0x520] sm:$0xff] }
 0x1a8   :  { %v1680_v39 = vperm.slane %v616_v23, %v2982_v50 }
 0x1aa   :  { %v1681_v2 = vsel %vm1437_vm2, %v1680_v39, %v1679_v35  ;;  %v177_v35 = vld [vmem:[%s4534_s0 + $0x510] sm:$0xff] }
 0x1ab   :  { %v1683_v22 = vsel %vm1441_vm3, %v1682_v52, %v1681_v2  ;;  %756 = vadd.xlane.f32.xlu2 %v755_v32  ;;  %753 = vadd.xlane.f32.xlu1 %v752_v26  ;;  %v761_v32 = vsel %vm271_vm0, %v178_v41, 0.0  ;;  %v758_v26 = vsel %vm271_vm0, %v177_v35, 0.0  ;;  %v181_v41 = vld [vmem:[%s4534_s0 + $0x530] sm:$0xff] }
 0x1ac   :  { %750 = vadd.xlane.f32.xlu0 %v749_v11  ;;  %v1685_v17 = vsel %vm1445_vm4, %v1684_v62, %v1683_v22  ;;  %v764_v62 = vsel %vm271_vm0, %v179_v15, 0.0  ;;  %v182_v15 = vld [vmem:[%s4534_s0 + $0x538] sm:$0xff] }
 0x1ae   :  { %v631_v48 = vpop.xlane.xlu2 %630  ;;  %v628_v23 = vpop.xlane.xlu1 %627 }
 0x1af   :  { %v1688_v20 = vperm.slane %v628_v23, %v3012_v4  ;;  %v625_v52 = vpop.xlane.xlu0 %624  ;;  %v1690_v39 = vperm.slane %v631_v48, %v3023_v16  ;;  %v1055_v48 = vld [vmem:[%s4535_s1 + $0x78] sm:$0xff] }
 0x1b0   :  { %v1686_v22 = vperm.slane %v625_v52, %v3002_v63  ;;  %1973 = vmatpush.msra.mxu0 %v1055_v48 }
 0x1b2   :  { %v1687_v11 = vsel %vm1449_vm5, %v1686_v22, %v1685_v17 }
 0x1b3   :  { %v1689_v2 = vsel %vm1453_vm6, %v1688_v20, %v1687_v11  ;;  %765 = vadd.xlane.f32.xlu2 %v764_v62  ;;  %762 = vadd.xlane.f32.xlu1 %v761_v32  ;;  %v180_v20 = vld [vmem:[%s4534_s0 + $0x528] sm:$0xff]  ;;  %v773_v32 = vsel %vm271_vm0, %v182_v15, 0.0  ;;  %v1054_v11 = vld [vmem:[%s4535_s1 + $0x70] sm:$0xff] }
 0x1b4   :  { %759 = vadd.xlane.f32.xlu0 %v758_v26  ;;  %v1691_v23 = vsel %vm1457_vm7, %v1690_v39, %v1689_v2  ;;  %v770_v26 = vsel %vm271_vm0, %v181_v41, 0.0  ;;  %v767_v2 = vsel %vm271_vm0, %v180_v20, 0.0  ;;  %1974 = vmatpush.msra.mxu0 %v1054_v11  ;;  %v1052_v41 = vld [vmem:[%s4535_s1 + $0x60] sm:$0xff]  ;;  %v184_v20 = vld [vmem:[%s4534_s0 + $0x548] sm:$0xff] }
 0x1b6   :  { %v640_v17 = vpop.xlane.xlu2 %639  ;;  %v637_v35 = vpop.xlane.xlu1 %636 }
 0x1b7   :  { %v1694_v52 = vperm.slane %v637_v35, %v3039_v24  ;;  %v634_v39 = vpop.xlane.xlu0 %633  ;;  %v1696_v22 = vperm.slane %v640_v17, %v3047_v7  ;;  %v1053_v35 = vld [vmem:[%s4535_s1 + $0x68] sm:$0xff] }
 0x1b8   :  { %v1692_v62 = vperm.slane %v634_v39, %v3029_v14  ;;  %1975 = vmatpush.msra.mxu0 %v1053_v35  ;;  %v779_v35 = vsel %vm271_vm0, %v184_v20, 0.0  ;;  %v1048_v20 = vld [vmem:[%s4535_s1 + $0x40] sm:$0xff] }
 0x1ba   :  { %v1693_v48 = vsel %vm4541_vm8, %v1692_v62, %v1691_v23  ;;  %v185_v23 = vld [vmem:[%s4534_s0 + $0x550] sm:$0xff]  ;;  %1976 = vmatpush.msra.mxu0 %v1052_v41 }
 0x1bb   :  { %v1695_v17 = vsel %vm4539_vm9, %v1694_v52, %v1693_v48  ;;  %774 = vadd.xlane.f32.xlu2 %v773_v32  ;;  %771 = vadd.xlane.f32.xlu1 %v770_v26  ;;  %v1051_v52 = vld [vmem:[%s4535_s1 + $0x58] sm:$0xff]  ;;  %v782_v48 = vsel %vm271_vm0, %v185_v23, 0.0 }
 0x1bc   :  { %768 = vadd.xlane.f32.xlu0 %v767_v2  ;;  %v1697_v15 = vsel %vm4540_vm10, %v1696_v22, %v1695_v17  ;;  %v183_v22 = vld [vmem:[%s4534_s0 + $0x540] sm:$0xff]  ;;  %1977 = vmatpush.msra.mxu0 %v1051_v52  ;;  %v1050_v17 = vld [vmem:[%s4535_s1 + $0x50] sm:$0xff] }
 0x1bd   :  { %v776_v5 = vsel %vm271_vm0, %v183_v22, 0.0  ;;  %v187_v52 = vld [vmem:[%s4534_s0 + $0x560] sm:$0xff]  ;;  %v1047_v22 = vld [vmem:[%s4535_s1 + $0x38] sm:$0xff] }
 0x1be   :  { %v649_v39 = vpop.xlane.xlu2 %648  ;;  %v646_v62 = vpop.xlane.xlu1 %645  ;;  %1978 = vmatpush.msra.mxu0 %v1050_v17  ;;  %v788_v17 = vsel %vm271_vm0, %v187_v52, 0.0  ;;  %v1430_v52 = vperm.slane %v2393_v31, %v2967_v25 }
 0x1bf   :  { %v1700_v32 = vperm.slane %v646_v62, %v3073_v36  ;;  %v643_v26 = vpop.xlane.xlu0 %642  ;;  %v1702_v11 = vperm.slane %v649_v39, %v3060_v51  ;;  %v1049_v39 = vld [vmem:[%s4535_s1 + $0x48] sm:$0xff] }
 0x1c0   :  { %v1698_v2 = vperm.slane %v643_v26, %v3056_v59  ;;  %1979 = vmatpush.msra.mxu0 %v1049_v39  ;;  %v186_v26 = vld [vmem:[%s4534_s0 + $0x558] sm:$0xff] }
 0x1c1   :  { %v785_v39 = vsel %vm271_vm0, %v186_v26, 0.0  ;;  %v1043_v26 = vld [vmem:[%s4535_s1 + $0x18] sm:$0xff] }
 0x1c2   :  { %v1699_v41 = vsel %vm4538_vm11, %v1698_v2, %v1697_v15  ;;  %v188_v15 = vld [vmem:[%s4534_s0 + $0x568] sm:$0xff]  ;;  %1980 = vmatpush.msra.mxu0 %v1048_v20 }
 0x1c3   :  { %v1701_v62 = vsel %vm1477_vm12, %v1700_v32, %v1699_v41  ;;  %783 = vadd.xlane.f32.xlu2 %v782_v48  ;;  %780 = vadd.xlane.f32.xlu1 %v779_v35  ;;  %v791_v35 = vsel %vm271_vm0, %v188_v15, 0.0  ;;  %v1046_v41 = vld [vmem:[%s4535_s1 + $0x30] sm:$0xff] }
 0x1c4   :  { %777 = vadd.xlane.f32.xlu0 %v776_v5  ;;  %v1703_v23 = vsel %vm1481_vm13, %v1702_v11, %v1701_v62  ;;  %1981 = vmatpush.msra.mxu0 %v1047_v22  ;;  %v1432_v62 = vperm.slane %v2411_v40, %v2971_v44  ;;  %v1044_v40 = vld [vmem:[%s4535_s1 + $0x20] sm:$0xff]  ;;  %v190_v22 = vld [vmem:[%s4534_s0 + $0x578] sm:$0xff] }
 0x1c6   :  { %v658_v5 = vpop.xlane.xlu2 %657  ;;  %v655_v32 = vpop.xlane.xlu1 %654  ;;  %1982 = vmatpush.msra.mxu0 %v1046_v41  ;;  %v1434_v31 = vsel %vm1433_vm1, %v1432_v62, %v1430_v52  ;;  %v1440_v41 = vperm.slane %v2406_v38, %v2988_v61  ;;  %v1042_v62 = vld [vmem:[%s4535_s1 + $0x10] sm:$0xff]  ;;  %v1041_v38 = vld [vmem:[%s4535_s1 + $0x8] sm:$0xff] }
 0x1c7   :  { %v1706_v11 = vperm.slane %v655_v32, %v3096_v34  ;;  %v652_v2 = vpop.xlane.xlu0 %651  ;;  %v1045_v32 = vld [vmem:[%s4535_s1 + $0x28] sm:$0xff] }
 0x1c8   :  { %v1704_v48 = vperm.slane %v652_v2, %v3070_v53  ;;  %1983 = vmatpush.msra.mxu0 %v1045_v32 }
 0x1ca   :  { %v1705_v20 = vsel %vm1485_vm14, %v1704_v48, %v1703_v23  ;;  %v191_v23 = vld [vmem:[%s4534_s0 + $0x580] sm:$0xff]  ;;  %v189_v48 = vld [vmem:[%s4534_s0 + $0x570] sm:$0xff]  ;;  %1984 = vmatpush.msra.mxu0 %v1044_v40  ;;  %v1708_v40 = vperm.slane %v658_v5, %v2967_v25  ;;  %v1444_v5 = vperm.slane %v2386_v28, %v2997_v13  ;;  %v1448_v28 = vperm.slane %v2404_v37, %v3002_v63 }
 0x1cb   :  { %792 = vadd.xlane.f32.xlu2 %v791_v35  ;;  %789 = vadd.xlane.f32.xlu1 %v788_v17  ;;  %v3234_v15 = vsel %vm1489_vm15, %v1706_v11, %v1705_v20  ;;  %v1436_v35 = vperm.slane %v2388_v29, %v2982_v50  ;;  %v797_v20 = vsel %vm271_vm0, %v190_v22, 0.0  ;;  %v794_v52 = vsel %vm271_vm0, %v189_v48, 0.0  ;;  %v1040_v22 = vld [vmem:[%s4535_s1] sm:$0xff]  ;;  %v193_v48 = vld [vmem:[%s4534_s0 + $0x590] sm:$0xff] }
 0x1cc   :  { %786 = vadd.xlane.f32.xlu0 %v785_v39  ;;  %v800_v39 = vsel %vm271_vm0, %v191_v23, 0.0  ;;  %1985 = vmatpush.msra.mxu0 %v1043_v26  ;;  %v1456_v37 = vperm.slane %v2424_v47, %v3023_v16  ;;  %v196_v47 = vld [vmem:[%s4534_s0 + $0x5a8] sm:$0xff] }
 0x1cd   :  { %v1438_v32 = vsel %vm1437_vm2, %v1436_v35, %v1434_v31  ;;  %v194_v31 = vld [vmem:[%s4534_s0 + $0x598] sm:$0xff] }
 0x1ce   :  { %v667_v11 = vpop.xlane.xlu2 %666  ;;  %v664_v2 = vpop.xlane.xlu1 %663  ;;  %1986 = vmatpush.msra.mxu0 %v1042_v62  ;;  %v1442_v23 = vsel %vm1441_vm3, %v1440_v41, %v1438_v32  ;;  %v1452_v62 = vperm.slane %v2429_v49, %v3012_v4 }
 0x1cf   :  { %v661_v17 = vpop.xlane.xlu0 %660  ;;  %v1711_v26 = vperm.slane %v664_v2, %v2982_v50  ;;  %v1446_v2 = vsel %vm1445_vm4, %v1444_v5, %v1442_v23  ;;  %v1713_v32 = vperm.slane %v667_v11, %v2988_v61 }
 0x1d0   :  { %v1709_v29 = vperm.slane %v661_v17, %v2971_v44  ;;  %1987 = vmatpush.msra.mxu0 %v1041_v38  ;;  %v1450_v23 = vsel %vm1449_vm5, %v1448_v28, %v1446_v2  ;;  %v1464_v2 = vperm.slane %v2447_v58, %v3039_v24 }
 0x1d1   :  { %v1454_v49 = vsel %vm1453_vm6, %v1452_v62, %v1450_v23 }
 0x1d2   :  { %v1710_v35 = vsel %vm1433_vm1, %v1709_v29, %v1708_v40  ;;  %1988 = vmatpush.msra.mxu0 %v1040_v22  ;;  %v806_v40 = vsel %vm271_vm0, %v193_v48, 0.0  ;;  %v1460_v48 = vperm.slane %v2422_v46, %v3029_v14  ;;  %v1458_v28 = vsel %vm1457_vm7, %v1456_v37, %v1454_v49  ;;  %v1071_v49 = vld [vmem:[%s4535_s1 + $0xf8] sm:$0xff] }
 0x1d3   :  { %801 = vadd.xlane.f32.xlu2 %v800_v39  ;;  %798 = vadd.xlane.f32.xlu1 %v797_v20  ;;  %v192_v39 = vld [vmem:[%s4534_s0 + $0x588] sm:$0xff]  ;;  %v1712_v29 = vsel %vm1437_vm2, %v1711_v26, %v1710_v35 }
 0x1d4   :  { %795 = vadd.xlane.f32.xlu0 %v794_v52  ;;  %v809_v52 = vsel %vm271_vm0, %v194_v31, 0.0  ;;  %v803_v22 = vsel %vm271_vm0, %v192_v39, 0.0  ;;  %v1714_v5 = vsel %vm1441_vm3, %v1713_v32, %v1712_v29  ;;  %v197_v31 = vld [vmem:[%s4534_s0 + $0x5b0] sm:$0xff]  ;;  %1993 = vmatpush.msra.mxu1 %v1071_v49 }
 0x1d5   :  { %v818_v46 = vsel %vm271_vm0, %v197_v31, 0.0  ;;  %v1066_v49 = vld [vmem:[%s4535_s1 + $0xd0] sm:$0xff] }
 0x1d6   :  { %v676_v17 = vpop.xlane.xlu2 %675  ;;  %v673_v41 = vpop.xlane.xlu1 %672 }
 0x1d7   :  { %v670_v20 = vpop.xlane.xlu0 %669  ;;  %v1717_v11 = vperm.slane %v673_v41, %v3002_v63  ;;  %v195_v41 = vld [vmem:[%s4534_s0 + $0x5a0] sm:$0xff] }
 0x1d8   :  { %v1715_v38 = vperm.slane %v670_v20, %v2997_v13  ;;  %v1719_v20 = vperm.slane %v676_v17, %v3012_v4  ;;  %v812_v29 = vsel %vm271_vm0, %v195_v41, 0.0 }
 0x1da   :  { %v1716_v26 = vsel %vm1445_vm4, %v1715_v38, %v1714_v5  ;;  %v1462_v38 = vsel %vm4541_vm8, %v1460_v48, %v1458_v28  ;;  %v199_v5 = vld [vmem:[%s4534_s0 + $0x5c0] sm:$0xff]  ;;  %v198_v48 = vld [vmem:[%s4534_s0 + $0x5b8] sm:$0xff] }
 0x1db   :  { %810 = vadd.xlane.f32.xlu2 %v809_v52  ;;  %807 = vadd.xlane.f32.xlu1 %v806_v40  ;;  %v1718_v32 = vsel %vm1449_vm5, %v1717_v11, %v1716_v26  ;;  %v815_v40 = vsel %vm271_vm0, %v196_v47, 0.0  ;;  %v1466_v37 = vsel %vm4539_vm9, %v1464_v2, %v1462_v38  ;;  %v1070_v11 = vld [vmem:[%s4535_s1 + $0xf0] sm:$0xff] }
 0x1dc   :  { %804 = vadd.xlane.f32.xlu0 %v803_v22  ;;  %v1468_v22 = vperm.slane %v2442_v56, %v3047_v7  ;;  %v1720_v17 = vsel %vm1453_vm6, %v1719_v20, %v1718_v32  ;;  %v200_v56 = vld [vmem:[%s4534_s0 + $0x5c8] sm:$0xff]  ;;  %1994 = vmatpush.msra.mxu1 %v1070_v11  ;;  %v1476_v20 = vperm.slane %v2465_v3, %v3073_v36  ;;  %v824_v32 = vsel %vm271_vm0, %v199_v5, 0.0  ;;  %v1068_v3 = vld [vmem:[%s4535_s1 + $0xe0] sm:$0xff] }
 0x1de   :  { %v685_v35 = vpop.xlane.xlu2 %684  ;;  %v682_v39 = vpop.xlane.xlu1 %681  ;;  %v1470_v41 = vsel %vm4540_vm10, %v1468_v22, %v1466_v37 }
 0x1df   :  { %v679_v62 = vpop.xlane.xlu0 %678  ;;  %v1723_v58 = vperm.slane %v682_v39, %v3029_v14  ;;  %v1725_v26 = vperm.slane %v685_v35, %v3039_v24  ;;  %v1472_v39 = vperm.slane %v2440_v55, %v3056_v59  ;;  %v821_v55 = vsel %vm271_vm0, %v198_v48, 0.0 }
 0x1e0   :  { %v1721_v52 = vperm.slane %v679_v62, %v3023_v16  ;;  %v827_v62 = vsel %vm271_vm0, %v200_v56, 0.0 }
 0x1e1   :  { %v1474_v38 = vsel %vm4538_vm11, %v1472_v39, %v1470_v41 }
 0x1e2   :  { %v1722_v23 = vsel %vm1457_vm7, %v1721_v52, %v1720_v17  ;;  %v1069_v52 = vld [vmem:[%s4535_s1 + $0xe8] sm:$0xff]  ;;  %v1067_v17 = vld [vmem:[%s4535_s1 + $0xd8] sm:$0xff] }
 0x1e3   :  { %819 = vadd.xlane.f32.xlu2 %v818_v46  ;;  %816 = vadd.xlane.f32.xlu1 %v815_v40  ;;  %v1724_v28 = vsel %vm4541_vm8, %v1723_v58, %v1722_v23  ;;  %v1478_v58 = vsel %vm1477_vm12, %v1476_v20, %v1474_v38  ;;  %v202_v23 = vld [vmem:[%s4534_s0 + $0x5d8] sm:$0xff] }
 0x1e4   :  { %813 = vadd.xlane.f32.xlu0 %v812_v29  ;;  %1995 = vmatpush.msra.mxu1 %v1069_v52  ;;  %v1726_v40 = vsel %vm4539_vm9, %v1725_v26, %v1724_v28  ;;  %v1480_v29 = vperm.slane %v2460_v1, %v3060_v51  ;;  %v203_v1 = vld [vmem:[%s4534_s0 + $0x5e0] sm:$0xff]  ;;  %v201_v26 = vld [vmem:[%s4534_s0 + $0x5d0] sm:$0xff] }
 0x1e5   :  { %v836_v20 = vsel %vm271_vm0, %v203_v1, 0.0  ;;  %v1064_v52 = vld [vmem:[%s4535_s1 + $0xc0] sm:$0xff] }
 0x1e6   :  { %v694_v31 = vpop.xlane.xlu2 %693  ;;  %v691_v47 = vpop.xlane.xlu1 %690  ;;  %1996 = vmatpush.msra.mxu1 %v1068_v3  ;;  %v1482_v41 = vsel %vm1481_vm13, %v1480_v29, %v1478_v58  ;;  %v1063_v29 = vld [vmem:[%s4535_s1 + $0xb8] sm:$0xff]  ;;  %v205_v58 = vld [vmem:[%s4534_s0 + $0x5f0] sm:$0xff] }
 0x1e7   :  { %v688_v2 = vpop.xlane.xlu0 %687  ;;  %v1729_v46 = vperm.slane %v691_v47, %v3056_v59  ;;  %v1731_v37 = vperm.slane %v694_v31, %v3073_v36  ;;  %v1484_v31 = vperm.slane %v2458_v0, %v3070_v53  ;;  %v1488_v47 = vperm.slane %v2483_v12, %v3096_v34  ;;  %v1065_v0 = vld [vmem:[%s4535_s1 + $0xc8] sm:$0xff] }
 0x1e8   :  { %v1727_v35 = vperm.slane %v688_v2, %v3047_v7  ;;  %1997 = vmatpush.msra.mxu1 %v1067_v17  ;;  %v1062_v17 = vld [vmem:[%s4535_s1 + $0xb0] sm:$0xff] }
 0x1ea   :  { %v1728_v22 = vsel %vm4540_vm10, %v1727_v35, %v1726_v40  ;;  %v833_v35 = vsel %vm271_vm0, %v202_v23, 0.0  ;;  %1998 = vmatpush.msra.mxu1 %v1066_v49  ;;  %v204_v23 = vld [vmem:[%s4534_s0 + $0x5e8] sm:$0xff] }
 0x1eb   :  { %828 = vadd.xlane.f32.xlu2 %v827_v62  ;;  %825 = vadd.xlane.f32.xlu1 %v824_v32  ;;  %v1730_v11 = vsel %vm4538_vm11, %v1729_v46, %v1728_v22  ;;  %v830_v62 = vsel %vm271_vm0, %v201_v26, 0.0  ;;  %vm1956_vm11 = vcmask 1041409   ;;  %v239_v22 = vld [vmem:[%s4534_s0 + $0x700] sm:$0xff]  ;;  %v839_v26 = vsel %vm271_vm0, %v204_v23, 0.0 }
 0x1ec   :  { %822 = vadd.xlane.f32.xlu0 %v821_v55  ;;  %v1732_v12 = vsel %vm1477_vm12, %v1731_v37, %v1730_v11  ;;  %1999 = vmatpush.msra.mxu1 %v1065_v0  ;;  %v1486_v55 = vsel %vm1485_vm14, %v1484_v31, %v1482_v41  ;;  %v944_v11 = vsel %vm271_vm0, %v239_v22, 0.0  ;;  %v1492_v31 = vperm.slane %v2476_v9, %v2971_v44  ;;  %v207_v9 = vld [vmem:[%s4534_s0 + $0x600] sm:$0xff] }
 0x1ed   :  { %v1490_v40 = vsel %vm1489_vm15, %v1488_v47, %v1486_v55  ;;  %v1491_v47 = vperm.slane %v2478_v10, %v2967_v25  ;;  %v1494_v41 = vperm.slane %v2501_v21, %v2982_v50  ;;  %v241_v10 = vld [vmem:[%s4534_s0 + $0x710] sm:$0xff] }
 0x1ee   :  { %v703_v56 = vpop.xlane.xlu2 %702  ;;  %v700_v5 = vpop.xlane.xlu1 %699  ;;  %2000 = vmatpush.msra.mxu1 %v1064_v52  ;;  %v848_v52 = vsel %vm271_vm0, %v207_v9, 0.0  ;;  %v950_v55 = vsel %vm271_vm0, %v241_v10, 0.0 }
 0x1ef   :  { %v1735_v48 = vperm.slane %v700_v5, %v3070_v53  ;;  %v697_v39 = vpop.xlane.xlu0 %696  ;;  %v1737_v28 = vperm.slane %v703_v56, %v3096_v34  ;;  %v842_v56 = vsel %vm271_vm0, %v205_v58, 0.0  ;;  %v1061_v5 = vld [vmem:[%s4535_s1 + $0xa8] sm:$0xff]  ;;  %v1498_v58 = vperm.slane %v2494_v18, %v2997_v13  ;;  %v242_v18 = vld [vmem:[%s4534_s0 + $0x718] sm:$0xff] }
 0x1f0   :  { %v1733_v2 = vperm.slane %v697_v39, %v3060_v51  ;;  %2001 = vmatpush.msra.mxu1 %v1063_v29  ;;  %v1059_v39 = vld [vmem:[%s4535_s1 + $0x98] sm:$0xff] }
 0x1f2   :  { %v1734_v32 = vsel %vm1481_vm13, %v1733_v2, %v1732_v12  ;;  %2002 = vmatpush.msra.mxu1 %v1062_v17  ;;  %v1493_v2 = vsel %vm1433_vm1, %v1492_v31, %v1491_v47  ;;  %v240_v12 = vld [vmem:[%s4534_s0 + $0x708] sm:$0xff]  ;;  %v1502_v47 = vperm.slane %v2514_v30, %v3012_v4 }
 0x1f3   :  { %837 = vadd.xlane.f32.xlu2 %v836_v20  ;;  %834 = vadd.xlane.f32.xlu1 %v833_v35  ;;  %v1736_v46 = vsel %vm1485_vm14, %v1735_v48, %v1734_v32  ;;  %v1060_v48 = vld [vmem:[%s4535_s1 + $0xa0] sm:$0xff]  ;;  %v1496_v32 = vperm.slane %v2496_v19, %v2988_v61  ;;  %v947_v29 = vsel %vm271_vm0, %v240_v12, 0.0  ;;  %v1506_v12 = vperm.slane %v2537_v45, %v3029_v14 }
 0x1f4   :  { %831 = vadd.xlane.f32.xlu0 %v830_v62  ;;  %v1738_v3 = vsel %vm1489_vm15, %v1737_v28, %v1736_v46  ;;  %2003 = vmatpush.msra.mxu1 %v1061_v5  ;;  %v1058_v28 = vld [vmem:[%s4535_s1 + $0x90] sm:$0xff]  ;;  %v1057_v46 = vld [vmem:[%s4535_s1 + $0x88] sm:$0xff]  ;;  %v1508_v45 = vperm.slane %v2532_v43, %v3039_v24 }
 0x1f5   :  { %v1957_v38 = vsel %vm1956_vm11, %v1738_v3, %v1490_v40  ;;  %v1495_v40 = vsel %vm1437_vm2, %v1494_v41, %v1493_v2  ;;  %v953_v41 = vsel %vm271_vm0, %v242_v18, 0.0 }
 0x1f6   :  { %1989 = vmatmul.f32.vlgmr.msra.gmra.mxu0 %v1957_v38  ;;  %v712_v37 = vpop.xlane.xlu2 %711  ;;  %v709_v1 = vpop.xlane.xlu1 %708  ;;  %2004 = vmatpush.msra.mxu1 %v1060_v48  ;;  %v1056_v38 = vld [vmem:[%s4535_s1 + $0x80] sm:$0xff]  ;;  %v1497_v17 = vsel %vm1441_vm3, %v1496_v32, %v1495_v40  ;;  %v209_v32 = vld [vmem:[%s4534_s0 + $0x610] sm:$0xff] }
 0x1f7   :  { %v706_v49 = vpop.xlane.xlu0 %705  ;;  %v1740_v20 = vperm.slane %v709_v1, %v2971_v44  ;;  %v1742_v3 = vperm.slane %v712_v37, %v2982_v50  ;;  %v1500_v37 = vperm.slane %v2519_v33, %v3002_v63  ;;  %v208_v33 = vld [vmem:[%s4534_s0 + $0x608] sm:$0xff] }
 0x1f8   :  { %v1739_v35 = vperm.slane %v706_v49, %v2967_v25  ;;  %2005 = vmatpush.msra.mxu1 %v1059_v39  ;;  %v255_v49 = vld [vmem:[%s4534_s0 + $0x780] sm:$0xff]  ;;  %v851_v2 = vsel %vm271_vm0, %v208_v33, 0.0 }
 0x1f9   :  { %v992_v39 = vsel %vm271_vm0, %v255_v49, 0.0 }
 0x1fa   :  { %2006 = vmatpush.msra.mxu1 %v1058_v28  ;;  %v1741_v19 = vsel %vm1433_vm1, %v1740_v20, %v1739_v35  ;;  %v1504_v20 = vperm.slane %v2512_v27, %v3023_v16  ;;  %v243_v27 = vld [vmem:[%s4534_s0 + $0x720] sm:$0xff] }
 0x1fb   :  { %945 = vadd.xlane.f32.xlu2 %v944_v11  ;;  %843 = vadd.xlane.f32.xlu1 %v842_v56  ;;  %v1743_v23 = vsel %vm1437_vm2, %v1742_v3, %v1741_v19 }
 0x1fc   :  { %840 = vadd.xlane.f32.xlu0 %v839_v26  ;;  %2007 = vmatpush.msra.mxu1 %v1057_v46  ;;  %v1499_v26 = vsel %vm1445_vm4, %v1498_v58, %v1497_v17  ;;  %v256_v46 = vld [vmem:[%s4534_s0 + $0x788] sm:$0xff]  ;;  %v956_v58 = vsel %vm271_vm0, %v243_v27, 0.0  ;;  %v854_v17 = vsel %vm271_vm0, %v209_v32, 0.0 }
 0x1fd   :  { %v1501_v9 = vsel %vm1449_vm5, %v1500_v37, %v1499_v26  ;;  %v995_v37 = vsel %vm271_vm0, %v256_v46, 0.0  ;;  %v223_v26 = vld [vmem:[%s4534_s0 + $0x680] sm:$0xff] }
 0x1fe   :  { %v721_v0 = vpop.xlane.xlu2 %720  ;;  %v718_v21 = vpop.xlane.xlu1 %717  ;;  %2008 = vmatpush.msra.mxu1 %v1056_v38  ;;  %v1503_v30 = vsel %vm1453_vm6, %v1502_v47, %v1501_v9  ;;  %v1086_v38 = vld [vmem:[%s4535_s1 + $0x170] sm:$0xff]  ;;  %v1080_v46 = vld [vmem:[%s4535_s1 + $0x140] sm:$0xff] }
 0x1ff   :  { %v715_v62 = vpop.xlane.xlu0 %714  ;;  %v1746_v1 = vperm.slane %v718_v21, %v2997_v13  ;;  %v1748_v48 = vperm.slane %v721_v0, %v3002_v63  ;;  %v1087_v21 = vld [vmem:[%s4535_s1 + $0x178] sm:$0xff]  ;;  %v1505_v40 = vsel %vm1457_vm7, %v1504_v20, %v1503_v30 }
 0x200   :  { %v1744_v22 = vperm.slane %v715_v62, %v2988_v61  ;;  %2013 = vmatpush.msra.mxu2 %v1087_v21  ;;  %v1507_v43 = vsel %vm4541_vm8, %v1506_v12, %v1505_v40  ;;  %v1081_v21 = vld [vmem:[%s4535_s1 + $0x148] sm:$0xff]  ;;  %v1516_v12 = vperm.slane %v2548_v54, %v3060_v51  ;;  %v1079_v54 = vld [vmem:[%s4535_s1 + $0x138] sm:$0xff] }
 0x201   :  { %v244_v40 = vld [vmem:[%s4534_s0 + $0x728] sm:$0xff] }
 0x202   :  { %v1745_v11 = vsel %vm1441_vm3, %v1744_v22, %v1743_v23  ;;  %2014 = vmatpush.msra.mxu2 %v1086_v38  ;;  %v1510_v23 = vperm.slane %v2530_v42, %v3047_v7  ;;  %v1083_v42 = vld [vmem:[%s4535_s1 + $0x158] sm:$0xff] }
 0x203   :  { %849 = vadd.xlane.f32.xlu2 %v848_v52  ;;  %951 = vadd.xlane.f32.xlu1 %v950_v55  ;;  %v1747_v10 = vsel %vm1445_vm4, %v1746_v1, %v1745_v11  ;;  %v1085_v1 = vld [vmem:[%s4535_s1 + $0x168] sm:$0xff]  ;;  %v1084_v11 = vld [vmem:[%s4535_s1 + $0x160] sm:$0xff] }
 0x204   :  { %948 = vadd.xlane.f32.xlu0 %v947_v29  ;;  %v1749_v0 = vsel %vm1449_vm5, %v1748_v48, %v1747_v10  ;;  %2015 = vmatpush.msra.mxu2 %v1085_v1 }
 0x206   :  { %v730_v56 = vpop.xlane.xlu2 %729  ;;  %v727_v5 = vpop.xlane.xlu1 %726  ;;  %2016 = vmatpush.msra.mxu2 %v1084_v11  ;;  %v1077_v11 = vld [vmem:[%s4535_s1 + $0x128] sm:$0xff] }
 0x207   :  { %v724_v31 = vpop.xlane.xlu0 %723  ;;  %v1752_v35 = vperm.slane %v727_v5, %v3023_v16  ;;  %v1754_v3 = vperm.slane %v730_v56, %v3029_v14  ;;  %v1509_v56 = vsel %vm4539_vm9, %v1508_v45, %v1507_v43  ;;  %v1512_v5 = vperm.slane %v2555_v60, %v3056_v59 }
 0x208   :  { %v1750_v28 = vperm.slane %v724_v31, %v3012_v4  ;;  %v210_v31 = vld [vmem:[%s4534_s0 + $0x618] sm:$0xff]  ;;  %2017 = vmatpush.msra.mxu2 %v1083_v42  ;;  %v1511_v9 = vsel %vm4540_vm10, %v1510_v23, %v1509_v56  ;;  %v959_v23 = vsel %vm271_vm0, %v244_v40, 0.0  ;;  %v1076_v42 = vld [vmem:[%s4535_s1 + $0x120] sm:$0xff] }
 0x209   :  { %v4613_v40 = vld [vmem:[#allocation11_spill] sm:$0xff] }
 0x20a   :  { %v1751_v62 = vsel %vm1453_vm6, %v1750_v28, %v1749_v0  ;;  %v857_v0 = vsel %vm271_vm0, %v210_v31, 0.0  ;;  %v4609_v31 = vld [vmem:[#allocation5_spill] sm:$0xff] }
 0x20b   :  { %993 = vadd.xlane.f32.xlu2 %v992_v39  ;;  %954 = vadd.xlane.f32.xlu1 %v953_v41  ;;  %v1753_v19 = vsel %vm1457_vm7, %v1752_v35, %v1751_v62  ;;  %v257_v39 = vld [vmem:[%s4534_s0 + $0x790] sm:$0xff]  ;;  %v1514_v41 = vperm.slane %v2550_v57, %v3073_v36  ;;  %v896_v35 = vsel %vm271_vm0, %v223_v26, 0.0  ;;  %v1075_v26 = vld [vmem:[%s4535_s1 + $0x118] sm:$0xff] }
 0x20c   :  { %852 = vadd.xlane.f32.xlu0 %v851_v2  ;;  %v1755_v18 = vsel %vm4541_vm8, %v1754_v3, %v1753_v19  ;;  %v1082_v2 = vld [vmem:[%s4535_s1 + $0x150] sm:$0xff]  ;;  %v998_v57 = vsel %vm271_vm0, %v257_v39, 0.0  ;;  %v1520_v3 = vperm.slane %v2568_v6, %v3096_v34  ;;  %v224_v19 = vld [vmem:[%s4534_s0 + $0x688] sm:$0xff] }
 0x20d   :  { %2018 = vmatpush.msra.mxu2 %v1082_v2  ;;  %v245_v39 = vld [vmem:[%s4534_s0 + $0x730] sm:$0xff] }
 0x20e   :  { %v739_v52 = vpop.xlane.xlu2 %738  ;;  %v736_v55 = vpop.xlane.xlu1 %735 }
 0x20f   :  { %v733_v29 = vpop.xlane.xlu0 %732  ;;  %v1758_v49 = vperm.slane %v736_v55, %v3047_v7  ;;  %v1760_v47 = vperm.slane %v739_v52, %v3056_v59  ;;  %2019 = vmatpush.msra.mxu2 %v1081_v21  ;;  %v1518_v52 = vperm.slane %v2573_v8, %v3070_v53  ;;  %v258_v8 = vld [vmem:[%s4534_s0 + $0x798] sm:$0xff]  ;;  %v962_v21 = vsel %vm271_vm0, %v245_v39, 0.0 }
 0x210   :  { %v1756_v22 = vperm.slane %v733_v29, %v3039_v24  ;;  %v1001_v1 = vsel %vm271_vm0, %v258_v8, 0.0 }
 0x211   :  { %2020 = vmatpush.msra.mxu2 %v1080_v46 }
 0x212   :  { %v1757_v33 = vsel %vm4539_vm9, %v1756_v22, %v1755_v18  ;;  %vm4607_vm9 = vcmask 786112  }
 0x213   :  { %957 = vadd.xlane.f32.xlu2 %v956_v58  ;;  %855 = vadd.xlane.f32.xlu1 %v854_v17  ;;  %v1759_v10 = vsel %vm4540_vm10, %v1758_v49, %v1757_v33  ;;  %v1513_v20 = vsel %vm4607_vm9, %v1512_v5, %v1511_v9  ;;  %vm4608_vm10 = vmmov %vm4607_vm9  ;;  %v899_v49 = vsel %vm271_vm0, %v224_v19, 0.0  ;;  %v212_v19 = vld [vmem:[%s4534_s0 + $0x628] sm:$0xff]  ;;  %vm4621_vm9 = vcmask 654912  }
 0x214   :  { %996 = vadd.xlane.f32.xlu0 %v995_v37  ;;  %v1761_v27 = vsel %vm4608_vm10, %v1760_v47, %v1759_v10  ;;  %v1515_v32 = vsel %vm1477_vm12, %v1514_v41, %v1513_v20  ;;  %2021 = vmatpush.msra.mxu2 %v1079_v54  ;;  %v1078_v37 = vld [vmem:[%s4535_s1 + $0x130] sm:$0xff]  ;;  %v1522_v47 = vperm.slane %v4609_v31, %v2967_v25  ;;  %vm4622_vm10 = vcmask 720512  }
 0x215   :  { %v1517_v22 = vsel %vm1481_vm13, %v1516_v12, %v1515_v32  ;;  %v225_v41 = vld [vmem:[%s4534_s0 + $0x690] sm:$0xff]  ;;  %v1073_v32 = vld [vmem:[%s4535_s1 + $0x108] sm:$0xff] }
 0x216   :  { %v748_v48 = vpop.xlane.xlu2 %747  ;;  %v745_v60 = vpop.xlane.xlu1 %744  ;;  %v1519_v43 = vsel %vm1485_vm14, %v1518_v52, %v1517_v22  ;;  %2022 = vmatpush.msra.mxu2 %v1078_v37  ;;  %v902_v12 = vsel %vm271_vm0, %v225_v41, 0.0  ;;  %v4614_v37 = vld [vmem:[#allocation10_spill] sm:$0xff] }
 0x217   :  { %v742_v28 = vpop.xlane.xlu0 %741  ;;  %v1764_v62 = vperm.slane %v745_v60, %v3060_v51  ;;  %v1766_v45 = vperm.slane %v748_v48, %v3070_v53  ;;  %v1521_v56 = vsel %vm1489_vm15, %v1520_v3, %v1519_v43  ;;  %v4610_v48 = vld [vmem:[#allocation8_spill] sm:$0xff]  ;;  %v1529_v3 = vperm.slane %v4613_v40, %v2997_v13  ;;  %v4619_v40 = vld [vmem:[#allocation17_spill] sm:$0xff] }
 0x218   :  { %v1762_v30 = vperm.slane %v742_v28, %v3073_v36  ;;  %2023 = vmatpush.msra.mxu2 %v1077_v11  ;;  %v1523_v60 = vperm.slane %v4610_v48, %v2971_v44  ;;  %v211_v28 = vld [vmem:[%s4534_s0 + $0x620] sm:$0xff]  ;;  %v4616_v48 = vld [vmem:[#allocation14_spill] sm:$0xff] }
 0x219   :  { %v259_v43 = vld [vmem:[%s4534_s0 + $0x7a0] sm:$0xff] }
 0x21a   :  { %v1763_v55 = vsel %vm1477_vm12, %v1762_v30, %v1761_v27  ;;  %2024 = vmatpush.msra.mxu2 %v1076_v42  ;;  %v860_v27 = vsel %vm271_vm0, %v211_v28, 0.0  ;;  %v1004_v42 = vsel %vm271_vm0, %v259_v43, 0.0  ;;  %v260_v28 = vld [vmem:[%s4534_s0 + $0x7a8] sm:$0xff]  ;;  %v261_v43 = vld [vmem:[%s4534_s0 + $0x7b0] sm:$0xff] }
 0x21b   :  { %897 = vadd.xlane.f32.xlu2 %v896_v35  ;;  %858 = vadd.xlane.f32.xlu1 %v857_v0  ;;  %v1765_v58 = vsel %vm1481_vm13, %v1764_v62, %v1763_v55  ;;  %v1074_v35 = vld [vmem:[%s4535_s1 + $0x110] sm:$0xff]  ;;  %v1524_v62 = vsel %vm1433_vm1, %v1523_v60, %v1522_v47  ;;  %v1535_v60 = vperm.slane %v4616_v48, %v3023_v16  ;;  %v4626_v48 = vld [vmem:[#allocation20_spill] sm:$0xff] }
 0x21c   :  { %999 = vadd.xlane.f32.xlu0 %v998_v57  ;;  %v1767_v18 = vsel %vm1485_vm14, %v1766_v45, %v1765_v58  ;;  %2025 = vmatpush.msra.mxu2 %v1075_v26  ;;  %v4611_v0 = vld [vmem:[#allocation7_spill] sm:$0xff]  ;;  %v4612_v55 = vld [vmem:[#allocation6_spill] sm:$0xff]  ;;  %v1072_v45 = vld [vmem:[%s4535_s1 + $0x100] sm:$0xff] }
 0x21d   :  { %v1525_v57 = vperm.slane %v4611_v0, %v2982_v50  ;;  %v1527_v46 = vperm.slane %v4612_v55, %v2988_v61  ;;  %v4615_v26 = vld [vmem:[#allocation9_spill] sm:$0xff]  ;;  %v1007_v55 = vsel %vm271_vm0, %v260_v28, 0.0  ;;  %v4629_v28 = vld [vmem:[#allocation19_spill] sm:$0xff] }
 0x21e   :  { %v757_v29 = vpop.xlane.xlu2 %756  ;;  %v754_v38 = vpop.xlane.xlu1 %753  ;;  %2026 = vmatpush.msra.mxu2 %v1074_v35  ;;  %v1533_v31 = vperm.slane %v4615_v26, %v3012_v4  ;;  %v1010_v26 = vsel %vm271_vm0, %v261_v43, 0.0  ;;  %v262_v43 = vld [vmem:[%s4534_s0 + $0x7b8] sm:$0xff] }
 0x21f   :  { %v751_v17 = vpop.xlane.xlu0 %750  ;;  %v1771_v2 = vperm.slane %v757_v29, %v2971_v44  ;;  %v1770_v20 = vperm.slane %v754_v38, %v2967_v25  ;;  %v1526_v8 = vsel %vm1437_vm2, %v1525_v57, %v1524_v62  ;;  %v226_v38 = vld [vmem:[%s4534_s0 + $0x698] sm:$0xff] }
 0x220   :  { %v1768_v6 = vperm.slane %v751_v17, %v3096_v34  ;;  %2027 = vmatpush.msra.mxu2 %v1073_v32  ;;  %v905_v11 = vsel %vm271_vm0, %v226_v38, 0.0  ;;  %v246_v57 = vld [vmem:[%s4534_s0 + $0x738] sm:$0xff] }
 0x221   :  { %v1772_v54 = vsel %vm1433_vm1, %v1771_v2, %v1770_v20  ;;  %v4617_v2 = vld [vmem:[#allocation13_spill] sm:$0xff] }
 0x222   :  { %v1769_v5 = vsel %vm1489_vm15, %v1768_v6, %v1767_v18  ;;  %2028 = vmatpush.msra.mxu2 %v1072_v45  ;;  %v1531_v6 = vperm.slane %v4614_v37, %v3002_v63  ;;  %v1537_v20 = vperm.slane %v4617_v2, %v3029_v14  ;;  %v965_v45 = vsel %vm271_vm0, %v246_v57, 0.0  ;;  %v247_v37 = vld [vmem:[%s4534_s0 + $0x740] sm:$0xff]  ;;  %v214_v57 = vld [vmem:[%s4534_s0 + $0x638] sm:$0xff] }
 0x223   :  { %1002 = vadd.xlane.f32.xlu2 %v1001_v1  ;;  %960 = vadd.xlane.f32.xlu1 %v959_v23  ;;  %v1958_v33 = vsel %vm1956_vm11, %v1769_v5, %v1521_v56  ;;  %v1528_v1 = vsel %vm1441_vm3, %v1527_v46, %v1526_v8  ;;  %v863_v56 = vsel %vm271_vm0, %v212_v19, 0.0  ;;  %v4618_v46 = vld [vmem:[#allocation12_spill] sm:$0xff]  ;;  %v1549_v2 = vperm.slane %v4629_v28, %v3070_v53 }
 0x224   :  { %900 = vadd.xlane.f32.xlu0 %v899_v49  ;;  %2009 = vmatmul.f32.vlgmr.msra.gmra.mxu1 %v1958_v33  ;;  %v1530_v49 = vsel %vm1445_vm4, %v1529_v3, %v1528_v1  ;;  %v1541_v3 = vperm.slane %v4619_v40, %v3047_v7 }
 0x225   :  { %v1532_v47 = vsel %vm1449_vm5, %v1531_v6, %v1530_v49 }
 0x226   :  { %v766_v9 = vpop.xlane.xlu2 %765  ;;  %v763_v10 = vpop.xlane.xlu1 %762 }
 0x227   :  { %v760_v30 = vpop.xlane.xlu0 %759  ;;  %v1775_v29 = vperm.slane %v763_v10, %v2988_v61  ;;  %v1777_v18 = vperm.slane %v766_v9, %v2997_v13  ;;  %v213_v10 = vld [vmem:[%s4534_s0 + $0x630] sm:$0xff] }
 0x228   :  { %v1773_v52 = vperm.slane %v760_v30, %v2982_v50  ;;  %v1534_v30 = vsel %vm1453_vm6, %v1533_v31, %v1532_v47  ;;  %v968_v31 = vsel %vm271_vm0, %v247_v37, 0.0 }
 0x22a   :  { %v1774_v22 = vsel %vm1437_vm2, %v1773_v52, %v1772_v54  ;;  %v866_v52 = vsel %vm271_vm0, %v213_v10, 0.0  ;;  %v1539_v54 = vperm.slane %v4618_v46, %v3039_v24 }
 0x22b   :  { %963 = vadd.xlane.f32.xlu2 %v962_v21  ;;  %903 = vadd.xlane.f32.xlu1 %v902_v12  ;;  %v1776_v5 = vsel %vm1441_vm3, %v1775_v29, %v1774_v22  ;;  %v1536_v21 = vsel %vm1457_vm7, %v1535_v60, %v1534_v30  ;;  %v4620_v22 = vld [vmem:[#allocation16_spill] sm:$0xff]  ;;  %v1547_v60 = vperm.slane %v4626_v48, %v3060_v51 }
 0x22c   :  { %861 = vadd.xlane.f32.xlu0 %v860_v27  ;;  %v1778_v41 = vsel %vm1445_vm4, %v1777_v18, %v1776_v5  ;;  %v1538_v8 = vsel %vm4541_vm8, %v1537_v20, %v1536_v21  ;;  %v227_v18 = vld [vmem:[%s4534_s0 + $0x6a0] sm:$0xff]  ;;  %v4624_v5 = vld [vmem:[#allocation15_spill] sm:$0xff] }
 0x22d   :  { %v263_v48 = vld [vmem:[%s4534_s0 + $0x7c0] sm:$0xff] }
 0x22e   :  { %v775_v58 = vpop.xlane.xlu2 %774  ;;  %v772_v17 = vpop.xlane.xlu1 %771 }
 0x22f   :  { %v769_v23 = vpop.xlane.xlu0 %768  ;;  %v1781_v39 = vperm.slane %v772_v17, %v3012_v4  ;;  %v1783_v12 = vperm.slane %v775_v58, %v3023_v16  ;;  %v1543_v58 = vperm.slane %v4620_v22, %v3056_v59  ;;  %v1540_v17 = vsel %vm4621_vm9, %v1539_v54, %v1538_v8 }
 0x230   :  { %v1779_v33 = vperm.slane %v769_v23, %v3002_v63  ;;  %v1542_v6 = vsel %vm4622_vm10, %v1541_v3, %v1540_v17  ;;  %v869_v8 = vsel %vm271_vm0, %v214_v57, 0.0  ;;  %v215_v17 = vld [vmem:[%s4534_s0 + $0x640] sm:$0xff] }
 0x232   :  { %v1780_v9 = vsel %vm1449_vm5, %v1779_v33, %v1778_v41  ;;  %v1545_v33 = vperm.slane %v4624_v5, %v3073_v36  ;;  %v872_v5 = vsel %vm271_vm0, %v215_v17, 0.0  ;;  %v217_v17 = vld [vmem:[%s4534_s0 + $0x650] sm:$0xff] }
 0x233   :  { %906 = vadd.xlane.f32.xlu2 %v905_v11  ;;  %864 = vadd.xlane.f32.xlu1 %v863_v56  ;;  %v1782_v27 = vsel %vm1453_vm6, %v1781_v39, %v1780_v9  ;;  %v908_v39 = vsel %vm271_vm0, %v227_v18, 0.0 }
 0x234   :  { %1005 = vadd.xlane.f32.xlu0 %v1004_v42  ;;  %v1784_v38 = vsel %vm1457_vm7, %v1783_v12, %v1782_v27  ;;  %v206_v27 = vld [vmem:[%s4534_s0 + $0x5f8] sm:$0xff] }
 0x235   :  { %v845_v3 = vsel %vm271_vm0, %v206_v27, 0.0  ;;  %v230_v27 = vld [vmem:[%s4534_s0 + $0x6b8] sm:$0xff] }
 0x236   :  { %v784_v35 = vpop.xlane.xlu2 %783  ;;  %v781_v0 = vpop.xlane.xlu1 %780 }
 0x237   :  { %v778_v62 = vpop.xlane.xlu0 %777  ;;  %v1787_v29 = vperm.slane %v781_v0, %v3039_v24  ;;  %v1789_v1 = vperm.slane %v784_v35, %v3047_v7  ;;  %v228_v0 = vld [vmem:[%s4534_s0 + $0x6a8] sm:$0xff] }
 0x238   :  { %v1785_v32 = vperm.slane %v778_v62, %v3029_v14 }
 0x23a   :  { %v1786_v19 = vsel %vm4541_vm8, %v1785_v32, %v1784_v38  ;;  %vm4623_vm8 = vmmov %vm4621_vm9  ;;  %vm4625_vm9 = vcmask 786112   ;;  %v4630_v32 = vld [vmem:[#allocation18_spill] sm:$0xff] }
 0x23b   :  { %867 = vadd.xlane.f32.xlu2 %v866_v52  ;;  %1008 = vadd.xlane.f32.xlu1 %v1007_v55  ;;  %v1788_v11 = vsel %vm4623_vm8, %v1787_v29, %v1786_v19  ;;  %v1544_v47 = vsel %vm4625_vm9, %v1543_v58, %v1542_v6  ;;  %vm4627_vm8 = vmmov %vm4622_vm10  ;;  %v1551_v52 = vperm.slane %v4630_v32, %v3096_v34 }
 0x23c   :  { %966 = vadd.xlane.f32.xlu0 %v965_v45  ;;  %v1790_v9 = vsel %vm4627_vm8, %v1789_v1, %v1788_v11  ;;  %vm4628_vm10 = vmmov %vm4625_vm9  ;;  %v1546_v20 = vsel %vm1477_vm12, %v1545_v33, %v1544_v47  ;;  %v911_v45 = vsel %vm271_vm0, %v228_v0, 0.0  ;;  %v1013_v33 = vsel %vm271_vm0, %v262_v43, 0.0 }
 0x23d   :  { %v1548_v30 = vsel %vm1481_vm13, %v1547_v60, %v1546_v20  ;;  %v249_v60 = vld [vmem:[%s4534_s0 + $0x750] sm:$0xff]  ;;  %vm4631_vm9 = vcmask 589312   ;;  %vm4632_vm8 = vcmask 654912  }
 0x23e   :  { %v793_v23 = vpop.xlane.xlu2 %792  ;;  %v790_v49 = vpop.xlane.xlu1 %789  ;;  %v1550_v40 = vsel %vm1485_vm14, %v1549_v2, %v1548_v30  ;;  %v1016_v30 = vsel %vm271_vm0, %v263_v48, 0.0 }
 0x23f   :  { %v787_v56 = vpop.xlane.xlu0 %786  ;;  %v1793_v41 = vperm.slane %v790_v49, %v3073_v36  ;;  %v1795_v35 = vperm.slane %v793_v23, %v3060_v51  ;;  %v1552_v19 = vsel %vm1489_vm15, %v1551_v52, %v1550_v40  ;;  %v248_v23 = vld [vmem:[%s4534_s0 + $0x748] sm:$0xff] }
 0x240   :  { %v1791_v42 = vperm.slane %v787_v56, %v3056_v59 }
 0x242   :  { %v1792_v10 = vsel %vm4628_vm10, %v1791_v42, %v1790_v9  ;;  %v971_v42 = vsel %vm271_vm0, %v248_v23, 0.0  ;;  %v229_v9 = vld [vmem:[%s4534_s0 + $0x6b0] sm:$0xff]  ;;  %vm4633_vm10 = vcmask 720512  }
 0x243   :  { %1011 = vadd.xlane.f32.xlu2 %v1010_v26  ;;  %969 = vadd.xlane.f32.xlu1 %v968_v31  ;;  %v1794_v21 = vsel %vm1477_vm12, %v1793_v41, %v1792_v10  ;;  %v914_v0 = vsel %vm271_vm0, %v229_v9, 0.0 }
 0x244   :  { %909 = vadd.xlane.f32.xlu0 %v908_v39  ;;  %v1796_v29 = vsel %vm1481_vm13, %v1795_v35, %v1794_v21  ;;  %v974_v35 = vsel %vm271_vm0, %v249_v60, 0.0 }
 0x246   :  { %v802_v12 = vpop.xlane.xlu2 %801  ;;  %v799_v62 = vpop.xlane.xlu1 %798 }
 0x247   :  { %v1799_v55 = vperm.slane %v799_v62, %v3096_v34  ;;  %v796_v46 = vpop.xlane.xlu0 %795  ;;  %v1801_v37 = vperm.slane %v802_v12, %v2967_v25  ;;  %v250_v62 = vld [vmem:[%s4534_s0 + $0x758] sm:$0xff] }
 0x248   :  { %v1797_v54 = vperm.slane %v796_v46, %v3070_v53  ;;  %v977_v40 = vsel %vm271_vm0, %v250_v62, 0.0 }
 0x24a   :  { %v1798_v38 = vsel %vm1485_vm14, %v1797_v54, %v1796_v29 }
 0x24b   :  { %912 = vadd.xlane.f32.xlu2 %v911_v45  ;;  %870 = vadd.xlane.f32.xlu1 %v869_v8  ;;  %v1800_v22 = vsel %vm1489_vm15, %v1799_v55, %v1798_v38  ;;  %v216_v55 = vld [vmem:[%s4534_s0 + $0x648] sm:$0xff] }
 0x24c   :  { %846 = vadd.xlane.f32.xlu0 %v845_v3  ;;  %v1959_v58 = vsel %vm1956_vm11, %v1800_v22, %v1552_v19  ;;  %v917_v3 = vsel %vm271_vm0, %v230_v27, 0.0  ;;  %v875_v29 = vsel %vm271_vm0, %v216_v55, 0.0  ;;  %v232_v27 = vld [vmem:[%s4534_s0 + $0x6c8] sm:$0xff] }
 0x24d   :  { %2029 = vmatmul.f32.vlgmr.msra.gmra.mxu2 %v1959_v58  ;;  %v231_v58 = vld [vmem:[%s4534_s0 + $0x6c0] sm:$0xff] }
 0x24e   :  { %v811_v6 = vpop.xlane.xlu2 %810  ;;  %v808_v1 = vpop.xlane.xlu1 %807 }
 0x24f   :  { %v1804_v49 = vperm.slane %v808_v1, %v2982_v50  ;;  %v805_v18 = vpop.xlane.xlu0 %804  ;;  %v1806_v11 = vperm.slane %v811_v6, %v2988_v61  ;;  %v264_v6 = vld [vmem:[%s4534_s0 + $0x7c8] sm:$0xff] }
 0x250   :  { %v1802_v56 = vperm.slane %v805_v18, %v2971_v44 }
 0x252   :  { %v1803_v26 = vsel %vm1433_vm1, %v1802_v56, %v1801_v37  ;;  %v878_v56 = vsel %vm271_vm0, %v217_v17, 0.0 }
 0x253   :  { %v1805_v31 = vsel %vm1437_vm2, %v1804_v49, %v1803_v26  ;;  %873 = vadd.xlane.f32.xlu2 %v872_v5  ;;  %1014 = vadd.xlane.f32.xlu1 %v1013_v33  ;;  %v1019_v5 = vsel %vm271_vm0, %v264_v6, 0.0 }
 0x254   :  { %972 = vadd.xlane.f32.xlu0 %v971_v42  ;;  %v1807_v47 = vsel %vm1441_vm3, %v1806_v11, %v1805_v31  ;;  %v920_v11 = vsel %vm271_vm0, %v231_v58, 0.0  ;;  %v218_v31 = vld [vmem:[%s4534_s0 + $0x658] sm:$0xff]  ;;  %v219_v58 = vld [vmem:[%s4534_s0 + $0x660] sm:$0xff] }
 0x256   :  { %v820_v39 = vpop.xlane.xlu2 %819  ;;  %v817_v41 = vpop.xlane.xlu1 %816 }
 0x257   :  { %v1810_v10 = vperm.slane %v817_v41, %v3002_v63  ;;  %v814_v28 = vpop.xlane.xlu0 %813  ;;  %v1812_v2 = vperm.slane %v820_v39, %v3012_v4  ;;  %v251_v39 = vld [vmem:[%s4534_s0 + $0x760] sm:$0xff] }
 0x258   :  { %v1808_v20 = vperm.slane %v814_v28, %v2997_v13  ;;  %v881_v28 = vsel %vm271_vm0, %v218_v31, 0.0 }
 0x25a   :  { %v1809_v57 = vsel %vm1445_vm4, %v1808_v20, %v1807_v47  ;;  %v265_v47 = vld [vmem:[%s4534_s0 + $0x7d0] sm:$0xff]  ;;  %v980_v20 = vsel %vm271_vm0, %v251_v39, 0.0 }
 0x25b   :  { %v1811_v21 = vsel %vm1449_vm5, %v1810_v10, %v1809_v57  ;;  %1017 = vadd.xlane.f32.xlu2 %v1016_v30  ;;  %975 = vadd.xlane.f32.xlu1 %v974_v35  ;;  %v252_v57 = vld [vmem:[%s4534_s0 + $0x768] sm:$0xff] }
 0x25c   :  { %915 = vadd.xlane.f32.xlu0 %v914_v0  ;;  %v1813_v12 = vsel %vm1453_vm6, %v1812_v2, %v1811_v21  ;;  %v1022_v2 = vsel %vm271_vm0, %v265_v47, 0.0  ;;  %v266_v0 = vld [vmem:[%s4534_s0 + $0x7d8] sm:$0xff]  ;;  %v267_v47 = vld [vmem:[%s4534_s0 + $0x7e0] sm:$0xff] }
 0x25e   :  { %v829_v32 = vpop.xlane.xlu2 %828  ;;  %v826_v52 = vpop.xlane.xlu1 %825 }
 0x25f   :  { %v1816_v46 = vperm.slane %v826_v52, %v3029_v14  ;;  %v823_v54 = vpop.xlane.xlu0 %822  ;;  %v1818_v45 = vperm.slane %v829_v32, %v3039_v24 }
 0x260   :  { %v1814_v8 = vperm.slane %v823_v54, %v3023_v16  ;;  %v983_v54 = vsel %vm271_vm0, %v252_v57, 0.0  ;;  %v1100_v57 = vld [vmem:[%s4535_s1 + $0x1e0] sm:$0xff] }
 0x262   :  { %v1815_v38 = vsel %vm1457_vm7, %v1814_v8, %v1813_v12 }
 0x263   :  { %v1817_v19 = vsel %vm4631_vm9, %v1816_v46, %v1815_v38  ;;  %978 = vadd.xlane.f32.xlu2 %v977_v40  ;;  %918 = vadd.xlane.f32.xlu1 %v917_v3  ;;  %vm4634_vm9 = vcmask 786112   ;;  %v1025_v46 = vsel %vm271_vm0, %v266_v0, 0.0  ;;  %v253_v3 = vld [vmem:[%s4534_s0 + $0x770] sm:$0xff] }
 0x264   :  { %876 = vadd.xlane.f32.xlu0 %v875_v29  ;;  %v1819_v22 = vsel %vm4632_vm8, %v1818_v45, %v1817_v19  ;;  %v923_v45 = vsel %vm271_vm0, %v232_v27, 0.0  ;;  %v233_v29 = vld [vmem:[%s4534_s0 + $0x6d0] sm:$0xff]  ;;  %v986_v6 = vsel %vm271_vm0, %v253_v3, 0.0  ;;  %v1097_v3 = vld [vmem:[%s4535_s1 + $0x1c8] sm:$0xff] }
 0x265   :  { %v1098_v27 = vld [vmem:[%s4535_s1 + $0x1d0] sm:$0xff] }
 0x266   :  { %v838_v43 = vpop.xlane.xlu2 %837  ;;  %v835_v37 = vpop.xlane.xlu1 %834 }
 0x267   :  { %v1822_v1 = vperm.slane %v835_v37, %v3056_v59  ;;  %v832_v23 = vpop.xlane.xlu0 %831  ;;  %v1824_v49 = vperm.slane %v838_v43, %v3073_v36 }
 0x268   :  { %v1820_v18 = vperm.slane %v832_v23, %v3047_v7 }
 0x26a   :  { %v1821_v33 = vsel %vm4633_vm10, %v1820_v18, %v1819_v22 }
 0x26b   :  { %v1823_v42 = vsel %vm4634_vm9, %v1822_v1, %v1821_v33  ;;  %921 = vadd.xlane.f32.xlu2 %v920_v11  ;;  %879 = vadd.xlane.f32.xlu1 %v878_v56  ;;  %v926_v1 = vsel %vm271_vm0, %v233_v29, 0.0  ;;  %v1103_v11 = vld [vmem:[%s4535_s1 + $0x1f8] sm:$0xff]  ;;  %v1102_v56 = vld [vmem:[%s4535_s1 + $0x1f0] sm:$0xff]  ;;  %v220_v33 = vld [vmem:[%s4534_s0 + $0x668] sm:$0xff] }
 0x26c   :  { %1020 = vadd.xlane.f32.xlu0 %v1019_v5  ;;  %v1825_v26 = vsel %vm1477_vm12, %v1824_v49, %v1823_v42  ;;  %v884_v49 = vsel %vm271_vm0, %v219_v58, 0.0  ;;  %v234_v5 = vld [vmem:[%s4534_s0 + $0x6d8] sm:$0xff]  ;;  %2033 = vmatpush.msra.mxu3 %v1103_v11 }
 0x26d   :  { %v1095_v58 = vld [vmem:[%s4535_s1 + $0x1b8] sm:$0xff] }
 0x26e   :  { %v946_v48 = vpop.xlane.xlu2 %945  ;;  %v844_v60 = vpop.xlane.xlu1 %843  ;;  %2034 = vmatpush.msra.mxu3 %v1102_v56 }
 0x26f   :  { %v1828_v41 = vperm.slane %v844_v60, %v3070_v53  ;;  %v841_v9 = vpop.xlane.xlu0 %840  ;;  %v1894_v21 = vperm.slane %v946_v48, %v2967_v25 }
 0x270   :  { %v1826_v10 = vperm.slane %v841_v9, %v3060_v51  ;;  %v929_v9 = vsel %vm271_vm0, %v234_v5, 0.0 }
 0x272   :  { %v1827_v30 = vsel %vm1481_vm13, %v1826_v10, %v1825_v26  ;;  %v887_v10 = vsel %vm271_vm0, %v220_v33, 0.0 }
 0x273   :  { %882 = vadd.xlane.f32.xlu2 %v881_v28  ;;  %1023 = vadd.xlane.f32.xlu1 %v1022_v2  ;;  %v3863_v35 = vsel %vm1485_vm14, %v1828_v41, %v1827_v30  ;;  %v1101_v28 = vld [vmem:[%s4535_s1 + $0x1e8] sm:$0xff]  ;;  %v1028_v30 = vsel %vm271_vm0, %v267_v47, 0.0 }
 0x274   :  { %981 = vadd.xlane.f32.xlu0 %v980_v20  ;;  %2035 = vmatpush.msra.mxu3 %v1101_v28  ;;  %v4636_v28 = vld [vmem:[#allocation23_spill] sm:$0xff] }
 0x276   :  { %v850_v12 = vpop.xlane.xlu2 %849  ;;  %v952_v62 = vpop.xlane.xlu1 %951  ;;  %2036 = vmatpush.msra.mxu3 %v1100_v57 }
 0x277   :  { %v1897_v32 = vperm.slane %v952_v62, %v2982_v50  ;;  %v949_v52 = vpop.xlane.xlu0 %948  ;;  %v1832_v38 = vperm.slane %v850_v12, %v2967_v25  ;;  %v221_v12 = vld [vmem:[%s4534_s0 + $0x670] sm:$0xff]  ;;  %v268_v62 = vld [vmem:[%s4534_s0 + $0x7e8] sm:$0xff] }
 0x278   :  { %v1895_v55 = vperm.slane %v949_v52, %v2971_v44 }
 0x27a   :  { %v1896_v8 = vsel %vm1433_vm1, %v1895_v55, %v1894_v21  ;;  %v1099_v21 = vld [vmem:[%s4535_s1 + $0x1d8] sm:$0xff] }
 0x27b   :  { %1026 = vadd.xlane.f32.xlu2 %v1025_v46  ;;  %984 = vadd.xlane.f32.xlu1 %v983_v54  ;;  %v1898_v40 = vsel %vm1437_vm2, %v1897_v32, %v1896_v8  ;;  %v254_v55 = vld [vmem:[%s4534_s0 + $0x778] sm:$0xff]  ;;  %v890_v8 = vsel %vm271_vm0, %v221_v12, 0.0  ;;  %v236_v12 = vld [vmem:[%s4534_s0 + $0x6e8] sm:$0xff] }
 0x27c   :  { %924 = vadd.xlane.f32.xlu0 %v923_v45  ;;  %2037 = vmatpush.msra.mxu3 %v1099_v21 }
 0x27e   :  { %v994_v19 = vpop.xlane.xlu2 %993  ;;  %v955_v22 = vpop.xlane.xlu1 %954  ;;  %2038 = vmatpush.msra.mxu3 %v1098_v27 }
 0x27f   :  { %v1899_v17 = vperm.slane %v955_v22, %v2988_v61  ;;  %v853_v43 = vpop.xlane.xlu0 %852  ;;  %v1925_v42 = vperm.slane %v994_v19, %v2967_v25  ;;  %v1096_v22 = vld [vmem:[%s4535_s1 + $0x1c0] sm:$0xff] }
 0x280   :  { %v1833_v37 = vperm.slane %v853_v43, %v2971_v44  ;;  %2039 = vmatpush.msra.mxu3 %v1097_v3  ;;  %v269_v43 = vld [vmem:[%s4534_s0 + $0x7f0] sm:$0xff] }
 0x281   :  { %v1900_v23 = vsel %vm1441_vm3, %v1899_v17, %v1898_v40  ;;  %v1031_v40 = vsel %vm271_vm0, %v268_v62, 0.0  ;;  %v222_v17 = vld [vmem:[%s4534_s0 + $0x678] sm:$0xff]  ;;  %v4637_v62 = vld [vmem:[#allocation21_spill] sm:$0xff]  ;;  %v4638_v3 = vld [vmem:[#allocation26_spill] sm:$0xff] }
 0x282   :  { %v1834_v18 = vsel %vm1433_vm1, %v1833_v37, %v1832_v38  ;;  %v989_v38 = vsel %vm271_vm0, %v254_v55, 0.0  ;;  %2040 = vmatpush.msra.mxu3 %v1096_v22  ;;  %v1094_v37 = vld [vmem:[%s4535_s1 + $0x1b0] sm:$0xff]  ;;  %v893_v33 = vsel %vm271_vm0, %v222_v17, 0.0  ;;  %v1556_v27 = vperm.slane %v4637_v62, %v2982_v50  ;;  %v1088_v17 = vld [vmem:[%s4535_s1 + $0x180] sm:$0xff] }
 0x283   :  { %987 = vadd.xlane.f32.xlu2 %v986_v6  ;;  %927 = vadd.xlane.f32.xlu1 %v926_v1 }
 0x284   :  { %885 = vadd.xlane.f32.xlu0 %v884_v49  ;;  %v235_v49 = vld [vmem:[%s4534_s0 + $0x6e0] sm:$0xff]  ;;  %2041 = vmatpush.msra.mxu3 %v1095_v58  ;;  %v935_v58 = vsel %vm271_vm0, %v236_v12, 0.0 }
 0x286   :  { %v958_v26 = vpop.xlane.xlu2 %957  ;;  %v856_v31 = vpop.xlane.xlu1 %855  ;;  %2042 = vmatpush.msra.mxu3 %v1094_v37  ;;  %v4639_v37 = vld [vmem:[#allocation25_spill] sm:$0xff] }
 0x287   :  { %v1901_v48 = vperm.slane %v958_v26, %v2997_v13  ;;  %v1835_v60 = vperm.slane %v856_v31, %v2982_v50  ;;  %v997_v39 = vpop.xlane.xlu0 %996  ;;  %v1093_v26 = vld [vmem:[%s4535_s1 + $0x1a8] sm:$0xff] }
 0x288   :  { %v1926_v41 = vperm.slane %v997_v39, %v2971_v44  ;;  %2043 = vmatpush.msra.mxu3 %v1093_v26  ;;  %v1092_v39 = vld [vmem:[%s4535_s1 + $0x1a0] sm:$0xff] }
 0x289   :  { %v1902_v2 = vsel %vm1445_vm4, %v1901_v48, %v1900_v23  ;;  %v1836_v20 = vsel %vm1437_vm2, %v1835_v60, %v1834_v18  ;;  %v932_v48 = vsel %vm271_vm0, %v235_v49, 0.0 }
 0x28a   :  { %v1927_v0 = vsel %vm1433_vm1, %v1926_v41, %v1925_v42  ;;  %v1034_v42 = vsel %vm271_vm0, %v269_v43, 0.0  ;;  %v1091_v41 = vld [vmem:[%s4535_s1 + $0x198] sm:$0xff]  ;;  %2044 = vmatpush.msra.mxu3 %v1092_v39 }
 0x28b   :  { %930 = vadd.xlane.f32.xlu2 %v929_v9  ;;  %888 = vadd.xlane.f32.xlu1 %v887_v10  ;;  %v4635_v9 = vld [vmem:[#allocation22_spill] sm:$0xff] }
 0x28c   :  { %1029 = vadd.xlane.f32.xlu0 %v1028_v30  ;;  %v1554_v10 = vperm.slane %v4635_v9, %v2971_v44  ;;  %v237_v30 = vld [vmem:[%s4534_s0 + $0x6f0] sm:$0xff]  ;;  %2045 = vmatpush.msra.mxu3 %v1091_v41 }
 0x28e   :  { %v898_v32 = vpop.xlane.xlu2 %897  ;;  %v859_v52 = vpop.xlane.xlu1 %858 }
 0x28f   :  { %v1837_v46 = vperm.slane %v859_v52, %v2988_v61  ;;  %v1000_v54 = vpop.xlane.xlu0 %999  ;;  %v1863_v6 = vperm.slane %v898_v32, %v2967_v25 }
 0x290   :  { %v1928_v45 = vperm.slane %v1000_v54, %v2982_v50 }
 0x291   :  { %v1838_v29 = vsel %vm1441_vm3, %v1837_v46, %v1836_v20  ;;  %v270_v20 = vld [vmem:[%s4534_s0 + $0x7f8] sm:$0xff] }
 0x292   :  { %v1929_v19 = vsel %vm1437_vm2, %v1928_v45, %v1927_v0  ;;  %v1090_v0 = vld [vmem:[%s4535_s1 + $0x190] sm:$0xff]  ;;  %v1037_v45 = vsel %vm271_vm0, %v270_v20, 0.0 }
 0x293   :  { %891 = vadd.xlane.f32.xlu2 %v890_v8  ;;  %1032 = vadd.xlane.f32.xlu1 %v1031_v40  ;;  %v938_v8 = vsel %vm271_vm0, %v237_v30, 0.0  ;;  %v1089_v40 = vld [vmem:[%s4535_s1 + $0x188] sm:$0xff] }
 0x294   :  { %990 = vadd.xlane.f32.xlu0 %v989_v38  ;;  %2046 = vmatpush.msra.mxu3 %v1090_v0  ;;  %v1558_v38 = vperm.slane %v4638_v3, %v2988_v61 }
 0x296   :  { %v1003_v1 = vpop.xlane.xlu2 %1002  ;;  %v961_v23 = vpop.xlane.xlu1 %960  ;;  %2047 = vmatpush.msra.mxu3 %v1089_v40  ;;  %v4645_v40 = vld [vmem:[#allocation31_spill] sm:$0xff] }
 0x297   :  { %v1930_v18 = vperm.slane %v1003_v1, %v2988_v61  ;;  %v1903_v11 = vperm.slane %v961_v23, %v3002_v63  ;;  %v901_v56 = vpop.xlane.xlu0 %900  ;;  %v1572_v3 = vperm.slane %v4645_v40, %v3047_v7  ;;  %v1150_v40 = vld [vmem:[%s4535_s1 + $0x370] sm:$0xff] }
 0x298   :  { %v1864_v5 = vperm.slane %v901_v56, %v2971_v44  ;;  %2048 = vmatpush.msra.mxu3 %v1088_v17 }
 0x299   :  { %v1931_v31 = vsel %vm1441_vm3, %v1930_v18, %v1929_v19  ;;  %v1904_v47 = vsel %vm1449_vm5, %v1903_v11, %v1902_v2  ;;  %v1553_v2 = vperm.slane %v4636_v28, %v2967_v25  ;;  %v238_v11 = vld [vmem:[%s4534_s0 + $0x6f8] sm:$0xff] }
 0x29a   :  { %v1865_v60 = vsel %vm1433_vm1, %v1864_v5, %v1863_v6  ;;  %v1560_v6 = vperm.slane %v4639_v37, %v2997_v13  ;;  %v941_v9 = vsel %vm271_vm0, %v238_v11, 0.0  ;;  %v4642_v28 = vld [vmem:[#allocation28_spill] sm:$0xff]  ;;  %vm4646_vm0 = vcmask 589312  }
 0x29b   :  { %894 = vadd.xlane.f32.xlu2 %v893_v33  ;;  %1035 = vadd.xlane.f32.xlu1 %v1034_v42  ;;  %v1555_v46 = vsel %vm1433_vm1, %v1554_v10, %v1553_v2  ;;  %v4640_v33 = vld [vmem:[#allocation24_spill] sm:$0xff]  ;;  %v1566_v2 = vperm.slane %v4642_v28, %v3023_v16  ;;  %vm4649_vm9 = vmmov %vm4646_vm0 }
 0x29c   :  { %933 = vadd.xlane.f32.xlu0 %v932_v48  ;;  %v1557_v1 = vsel %vm1437_vm2, %v1556_v27, %v1555_v46  ;;  %v1562_v42 = vperm.slane %v4640_v33, %v3002_v63  ;;  %v4641_v48 = vld [vmem:[#allocation29_spill] sm:$0xff] }
 0x29d   :  { %v1559_v23 = vsel %vm1441_vm3, %v1558_v38, %v1557_v1  ;;  %v4648_v1 = vld [vmem:[#allocation35_spill] sm:$0xff] }
 0x29e   :  { %v964_v57 = vpop.xlane.xlu2 %963  ;;  %v904_v21 = vpop.xlane.xlu1 %903  ;;  %v1561_v26 = vsel %vm1445_vm4, %v1560_v6, %v1559_v23  ;;  %v1576_v23 = vperm.slane %v4648_v1, %v3073_v36  ;;  %v1148_v1 = vld [vmem:[%s4535_s1 + $0x360] sm:$0xff] }
 0x29f   :  { %v1905_v32 = vperm.slane %v964_v57, %v3012_v4  ;;  %v1866_v52 = vperm.slane %v904_v21, %v2982_v50  ;;  %v862_v55 = vpop.xlane.xlu0 %861  ;;  %v1563_v20 = vsel %vm1449_vm5, %v1562_v42, %v1561_v26  ;;  %v4643_v21 = vld [vmem:[#allocation27_spill] sm:$0xff] }
 0x2a0   :  { %v1839_v54 = vperm.slane %v862_v55, %v2997_v13  ;;  %v1568_v12 = vperm.slane %v4643_v21, %v3029_v14 }
 0x2a1   :  { %v1906_v19 = vsel %vm1453_vm6, %v1905_v32, %v1904_v47  ;;  %v1867_v22 = vsel %vm1437_vm2, %v1866_v52, %v1865_v60  ;;  %v1564_v60 = vperm.slane %v4641_v48, %v3012_v4  ;;  %v4644_v52 = vld [vmem:[#allocation32_spill] sm:$0xff]  ;;  %v4652_v48 = vld [vmem:[#allocation33_spill] sm:$0xff] }
 0x2a2   :  { %v1840_v43 = vsel %vm1445_vm4, %v1839_v54, %v1838_v29  ;;  %v1570_v55 = vperm.slane %v4644_v52, %v3039_v24 }
 0x2a3   :  { %1038 = vadd.xlane.f32.xlu1 %v1037_v45  ;;  %939 = vadd.xlane.f32.xlu2 %v938_v8  ;;  %v1565_v30 = vsel %vm1453_vm6, %v1564_v60, %v1563_v20  ;;  %v1580_v60 = vperm.slane %v4652_v48, %v3070_v53  ;;  %v1116_v48 = vld [vmem:[%s4535_s1 + $0x260] sm:$0xff] }
 0x2a4   :  { %936 = vadd.xlane.f32.xlu0 %v935_v58  ;;  %v4647_v58 = vld [vmem:[#allocation30_spill] sm:$0xff] }
 0x2a5   :  { %v1574_v17 = vperm.slane %v4647_v58, %v3056_v59 }
 0x2a6   :  { %v907_v49 = vpop.xlane.xlu2 %906  ;;  %v865_v18 = vpop.xlane.xlu1 %864 }
 0x2a7   :  { %v1868_v29 = vperm.slane %v907_v49, %v2988_v61  ;;  %v1841_v56 = vperm.slane %v865_v18, %v3002_v63  ;;  %v1006_v5 = vpop.xlane.xlu0 %1005 }
 0x2a8   :  { %v1932_v47 = vperm.slane %v1006_v5, %v2997_v13  ;;  %v4650_v5 = vld [vmem:[#allocation34_spill] sm:$0xff] }
 0x2a9   :  { %v1869_v39 = vsel %vm1441_vm3, %v1868_v29, %v1867_v22  ;;  %v1842_v41 = vsel %vm1449_vm5, %v1841_v56, %v1840_v43  ;;  %v1578_v33 = vperm.slane %v4650_v5, %v3060_v51 }
 0x2aa   :  { %v1933_v10 = vsel %vm1445_vm4, %v1932_v47, %v1931_v31  ;;  %v1567_v31 = vsel %vm1457_vm7, %v1566_v2, %v1565_v30 }
 0x2ab   :  { %v1569_v38 = vsel %vm4646_vm0, %v1568_v12, %v1567_v31  ;;  %vm4651_vm0 = vcmask 786112  }
 0x2ac   :  { %942 = vadd.xlane.f32.xlu0 %v941_v9  ;;  %v1571_v22 = vsel %vm4632_vm8, %v1570_v55, %v1569_v38  ;;  %vm4654_vm8 = vmmov %vm4649_vm9 }
 0x2ad   :  { %v1573_v6 = vsel %vm4633_vm10, %v1572_v3, %v1571_v22  ;;  %vm4655_vm10 = vmmov %vm4654_vm8 }
 0x2ae   :  { %v868_v0 = vpop.xlane.xlu2 %867  ;;  %v1009_v57 = vpop.xlane.xlu1 %1008  ;;  %v1575_v42 = vsel %vm4651_vm0, %v1574_v17, %v1573_v6  ;;  %vm4671_vm0 = vcmask 654912  }
 0x2af   :  { %v1843_v62 = vperm.slane %v868_v0, %v3012_v4  ;;  %v1934_v27 = vperm.slane %v1009_v57, %v3002_v63  ;;  %v967_v32 = vpop.xlane.xlu0 %966  ;;  %v1577_v47 = vsel %vm1477_vm12, %v1576_v23, %v1575_v42  ;;  %v1119_v23 = vld [vmem:[%s4535_s1 + $0x278] sm:$0xff]  ;;  %v1117_v42 = vld [vmem:[%s4535_s1 + $0x268] sm:$0xff] }
 0x2b0   :  { %v1907_v46 = vperm.slane %v967_v32, %v3023_v16  ;;  %v1579_v2 = vsel %vm1481_vm13, %v1578_v33, %v1577_v47  ;;  %2053 = vmatpush.msrb.mxu0 %v1119_v23  ;;  %v4656_v23 = vld [vmem:[#allocation36_spill] sm:$0xff] }
 0x2b1   :  { %v1844_v54 = vsel %vm1453_vm6, %v1843_v62, %v1842_v41  ;;  %v1935_v45 = vsel %vm1449_vm5, %v1934_v27, %v1933_v10  ;;  %v4653_v41 = vld [vmem:[#allocation38_spill] sm:$0xff]  ;;  %v1581_v12 = vsel %vm1485_vm14, %v1580_v60, %v1579_v2  ;;  %v1144_v60 = vld [vmem:[%s4535_s1 + $0x340] sm:$0xff] }
 0x2b2   :  { %v1908_v8 = vsel %vm1457_vm7, %v1907_v46, %v1906_v19  ;;  %v1582_v9 = vperm.slane %v4653_v41, %v3096_v34  ;;  %v1115_v41 = vld [vmem:[%s4535_s1 + $0x258] sm:$0xff]  ;;  %v1142_v2 = vld [vmem:[%s4535_s1 + $0x330] sm:$0xff] }
 0x2b4   :  { %v1583_v62 = vsel %vm1489_vm15, %v1582_v9, %v1581_v12  ;;  %v1143_v9 = vld [vmem:[%s4535_s1 + $0x338] sm:$0xff]  ;;  %v1165_v12 = vld [vmem:[%s4535_s1 + $0x3e8] sm:$0xff] }
 0x2b6   :  { %v1012_v43 = vpop.xlane.xlu2 %1011  ;;  %v970_v37 = vpop.xlane.xlu1 %969 }
 0x2b7   :  { %v1936_v49 = vperm.slane %v1012_v43, %v3012_v4  ;;  %v1909_v19 = vperm.slane %v970_v37, %v3029_v14  ;;  %v910_v18 = vpop.xlane.xlu0 %909  ;;  %v1149_v43 = vld [vmem:[%s4535_s1 + $0x368] sm:$0xff] }
 0x2b8   :  { %v1870_v11 = vperm.slane %v910_v18, %v2997_v13  ;;  %v1146_v18 = vld [vmem:[%s4535_s1 + $0x350] sm:$0xff] }
 0x2b9   :  { %v1937_v29 = vsel %vm1453_vm6, %v1936_v49, %v1935_v45  ;;  %v4076_v56 = vsel %vm4649_vm9, %v1909_v19, %v1908_v8  ;;  %v1147_v49 = vld [vmem:[%s4535_s1 + $0x358] sm:$0xff]  ;;  %v1118_v19 = vld [vmem:[%s4535_s1 + $0x270] sm:$0xff]  ;;  %vm4668_vm9 = vmmov %vm4654_vm8 }
 0x2ba   :  { %v1871_v26 = vsel %vm1445_vm4, %v1870_v11, %v1869_v39  ;;  %2054 = vmatpush.msrb.mxu0 %v1118_v19  ;;  %v4657_v19 = vld [vmem:[#allocation37_spill] sm:$0xff] }
 0x2bc   :  { %2055 = vmatpush.msrb.mxu0 %v1117_v42  ;;  %v1132_v42 = vld [vmem:[%s4535_s1 + $0x2e0] sm:$0xff] }
 0x2be   :  { %v913_v10 = vpop.xlane.xlu2 %912  ;;  %v871_v28 = vpop.xlane.xlu1 %870  ;;  %2056 = vmatpush.msrb.mxu0 %v1116_v48  ;;  %v1160_v48 = vld [vmem:[%s4535_s1 + $0x3c0] sm:$0xff] }
 0x2bf   :  { %v1872_v20 = vperm.slane %v913_v10, %v3002_v63  ;;  %v1845_v30 = vperm.slane %v871_v28, %v3023_v16  ;;  %v847_v0 = vpop.xlane.xlu0 %846  ;;  %v1167_v10 = vld [vmem:[%s4535_s1 + $0x3f8] sm:$0xff]  ;;  %v1114_v28 = vld [vmem:[%s4535_s1 + $0x250] sm:$0xff] }
 0x2c0   :  { %v1830_v57 = vperm.slane %v847_v0, %v3096_v34  ;;  %2113 = vmatpush.msrb.mxu3 %v1167_v10  ;;  %2057 = vmatpush.msrb.mxu0 %v1115_v41  ;;  %v1131_v10 = vld [vmem:[%s4535_s1 + $0x2d8] sm:$0xff] }
 0x2c1   :  { %v1873_v39 = vsel %vm1449_vm5, %v1872_v20, %v1871_v26  ;;  %v1846_v21 = vsel %vm1457_vm7, %v1845_v30, %v1844_v54  ;;  %v1145_v26 = vld [vmem:[%s4535_s1 + $0x348] sm:$0xff]  ;;  %v1166_v20 = vld [vmem:[%s4535_s1 + $0x3f0] sm:$0xff] }
 0x2c2   :  { %v1831_v27 = vsel %vm1489_vm15, %v1830_v57, %v3863_v35  ;;  %v1151_v35 = vld [vmem:[%s4535_s1 + $0x378] sm:$0xff]  ;;  %2114 = vmatpush.msrb.mxu3 %v1166_v20  ;;  %2058 = vmatpush.msrb.mxu0 %v1114_v28  ;;  %v1106_v20 = vld [vmem:[%s4535_s1 + $0x210] sm:$0xff] }
 0x2c3   :  { %v1960_v32 = vsel %vm1956_vm11, %v1831_v27, %v1583_v62  ;;  %2093 = vmatpush.msrb.mxu2 %v1151_v35  ;;  %v1112_v62 = vld [vmem:[%s4535_s1 + $0x240] sm:$0xff]  ;;  %v1134_v35 = vld [vmem:[%s4535_s1 + $0x2f0] sm:$0xff]  ;;  %v1159_v28 = vld [vmem:[%s4535_s1 + $0x3b8] sm:$0xff] }
 0x2c4   :  { %2049 = vmatmul.f32.vlgmr.msra.gmra.mxu3 %v1960_v32  ;;  %v1140_v27 = vld [vmem:[%s4535_s1 + $0x320] sm:$0xff] }
 0x2c5   :  { %2094 = vmatpush.msrb.mxu2 %v1150_v40  ;;  %2115 = vmatpush.msrb.mxu3 %v1165_v12  ;;  %v1164_v32 = vld [vmem:[%s4535_s1 + $0x3e0] sm:$0xff]  ;;  %v1138_v40 = vld [vmem:[%s4535_s1 + $0x310] sm:$0xff] }
 0x2c6   :  { %v874_v31 = vpop.xlane.xlu2 %873  ;;  %v1015_v52 = vpop.xlane.xlu1 %1014 }
 0x2c7   :  { %v1847_v55 = vperm.slane %v874_v31, %v3029_v14  ;;  %v1938_v46 = vperm.slane %v1015_v52, %v3023_v16  ;;  %v4100_v45 = vpop.xlane.xlu0 %972  ;;  %2095 = vmatpush.msrb.mxu2 %v1149_v43  ;;  %v1111_v31 = vld [vmem:[%s4535_s1 + $0x238] sm:$0xff]  ;;  %2116 = vmatpush.msrb.mxu3 %v1164_v32  ;;  %v1109_v43 = vld [vmem:[%s4535_s1 + $0x228] sm:$0xff] }
 0x2c8   :  { %v1135_v52 = vld [vmem:[%s4535_s1 + $0x2f8] sm:$0xff] }
 0x2c9   :  { %v4103_v54 = vsel %vm4654_vm8, %v1847_v55, %v1846_v21  ;;  %v1939_v8 = vsel %vm1457_vm7, %v1938_v46, %v1937_v29  ;;  %2096 = vmatpush.msrb.mxu2 %v1148_v1  ;;  %v1141_v21 = vld [vmem:[%s4535_s1 + $0x328] sm:$0xff]  ;;  %v1139_v55 = vld [vmem:[%s4535_s1 + $0x318] sm:$0xff]  ;;  %2073 = vmatpush.msrb.mxu1 %v1135_v52  ;;  %vm4677_vm8 = vmmov %vm4671_vm0 }
 0x2ca   :  { %v1163_v46 = vld [vmem:[%s4535_s1 + $0x3d8] sm:$0xff]  ;;  %v1137_v1 = vld [vmem:[%s4535_s1 + $0x308] sm:$0xff] }
 0x2cb   :  { %2097 = vmatpush.msrb.mxu2 %v1147_v49  ;;  %2117 = vmatpush.msrb.mxu3 %v1163_v46  ;;  %v1585_v49 = vperm.slane %v4656_v23, %v2971_v44  ;;  %v1129_v46 = vld [vmem:[%s4535_s1 + $0x2c8] sm:$0xff]  ;;  %v4661_v23 = vld [vmem:[#allocation44_spill] sm:$0xff] }
 0x2cc   :  { %2074 = vmatpush.msrb.mxu1 %v1134_v35  ;;  %v4660_v35 = vld [vmem:[#allocation39_spill] sm:$0xff] }
 0x2cd   :  { %2098 = vmatpush.msrb.mxu2 %v1146_v18  ;;  %v1584_v18 = vperm.slane %v4657_v19, %v2967_v25  ;;  %v1127_v19 = vld [vmem:[%s4535_s1 + $0x2b8] sm:$0xff] }
 0x2ce   :  { %v1018_v3 = vpop.xlane.xlu2 %1017  ;;  %v4112_v38 = vpop.xlane.xlu1 %975 }
 0x2cf   :  { %v1940_v22 = vperm.slane %v1018_v3, %v3029_v14  ;;  %v916_v58 = vpop.xlane.xlu0 %915  ;;  %2099 = vmatpush.msrb.mxu2 %v1145_v26  ;;  %v1162_v3 = vld [vmem:[%s4535_s1 + $0x3d0] sm:$0xff]  ;;  %v1136_v26 = vld [vmem:[%s4535_s1 + $0x300] sm:$0xff] }
 0x2d0   :  { %v1874_v17 = vperm.slane %v916_v58, %v3012_v4  ;;  %2118 = vmatpush.msrb.mxu3 %v1162_v3  ;;  %v1104_v3 = vld [vmem:[%s4535_s1 + $0x200] sm:$0xff] }
 0x2d1   :  { %v4120_v37 = vsel %vm4655_vm10, %v1940_v22, %v1939_v8  ;;  %2100 = vmatpush.msrb.mxu2 %v1144_v60  ;;  %v1110_v8 = vld [vmem:[%s4535_s1 + $0x230] sm:$0xff]  ;;  %v4658_v60 = vld [vmem:[#allocation41_spill] sm:$0xff]  ;;  %vm4678_vm10 = vcmask 786112  }
 0x2d2   :  { %v1875_v6 = vsel %vm1453_vm6, %v1874_v17, %v1873_v39  ;;  %v1113_v39 = vld [vmem:[%s4535_s1 + $0x248] sm:$0xff]  ;;  %v1587_v41 = vperm.slane %v4658_v60, %v2982_v50 }
 0x2d3   :  { %2101 = vmatpush.msrb.mxu2 %v1143_v9  ;;  %2059 = vmatpush.msrb.mxu0 %v1113_v39  ;;  %v1107_v9 = vld [vmem:[%s4535_s1 + $0x218] sm:$0xff]  ;;  %v1130_v39 = vld [vmem:[%s4535_s1 + $0x2d0] sm:$0xff] }
 0x2d5   :  { %2102 = vmatpush.msrb.mxu2 %v1142_v2  ;;  %2060 = vmatpush.msrb.mxu0 %v1112_v62  ;;  %v1586_v2 = vsel %vm1433_vm1, %v1585_v49, %v1584_v18  ;;  %v1593_v49 = vperm.slane %v4661_v23, %v3002_v63  ;;  %v1155_v18 = vld [vmem:[%s4535_s1 + $0x398] sm:$0xff] }
 0x2d6   :  { %v4138_v11 = vpop.xlane.xlu2 %978  ;;  %v919_v29 = vpop.xlane.xlu1 %918  ;;  %v1588_v52 = vsel %vm1437_vm2, %v1587_v41, %v1586_v2  ;;  %v1153_v2 = vld [vmem:[%s4535_s1 + $0x388] sm:$0xff] }
 0x2d7   :  { %v1876_v5 = vperm.slane %v919_v29, %v3023_v16  ;;  %v4141_v33 = vpop.xlane.xlu0 %876  ;;  %2103 = vmatpush.msrb.mxu2 %v1141_v21  ;;  %2061 = vmatpush.msrb.mxu0 %v1111_v31  ;;  %v1161_v29 = vld [vmem:[%s4535_s1 + $0x3c8] sm:$0xff]  ;;  %v1158_v21 = vld [vmem:[%s4535_s1 + $0x3b0] sm:$0xff] }
 0x2d8   :  { %2119 = vmatpush.msrb.mxu3 %v1161_v29  ;;  %v1126_v29 = vld [vmem:[%s4535_s1 + $0x2b0] sm:$0xff] }
 0x2d9   :  { %v4150_v47 = vsel %vm1457_vm7, %v1876_v5, %v1875_v6  ;;  %2104 = vmatpush.msrb.mxu2 %v1140_v27  ;;  %2062 = vmatpush.msrb.mxu0 %v1110_v8  ;;  %v1133_v6 = vld [vmem:[%s4535_s1 + $0x2e8] sm:$0xff]  ;;  %v1108_v5 = vld [vmem:[%s4535_s1 + $0x220] sm:$0xff] }
 0x2da   :  { %2075 = vmatpush.msrb.mxu1 %v1133_v6  ;;  %2120 = vmatpush.msrb.mxu3 %v1160_v48  ;;  %v4659_v27 = vld [vmem:[#allocation40_spill] sm:$0xff]  ;;  %v1157_v8 = vld [vmem:[%s4535_s1 + $0x3a8] sm:$0xff] }
 0x2db   :  { %2105 = vmatpush.msrb.mxu2 %v1139_v55  ;;  %2063 = vmatpush.msrb.mxu0 %v1109_v43  ;;  %v1589_v32 = vperm.slane %v4659_v27, %v2988_v61  ;;  %v1105_v55 = vld [vmem:[%s4535_s1 + $0x208] sm:$0xff]  ;;  %v1128_v43 = vld [vmem:[%s4535_s1 + $0x2c0] sm:$0xff]  ;;  %v4664_v27 = vld [vmem:[#allocation47_spill] sm:$0xff] }
 0x2dc   :  { %2076 = vmatpush.msrb.mxu1 %v1132_v42  ;;  %2121 = vmatpush.msrb.mxu3 %v1159_v28  ;;  %v1156_v6 = vld [vmem:[%s4535_s1 + $0x3a0] sm:$0xff]  ;;  %v4662_v42 = vld [vmem:[#allocation43_spill] sm:$0xff]  ;;  %v1125_v28 = vld [vmem:[%s4535_s1 + $0x2a8] sm:$0xff] }
 0x2dd   :  { %2106 = vmatpush.msrb.mxu2 %v1138_v40  ;;  %2064 = vmatpush.msrb.mxu0 %v1108_v5  ;;  %v1591_v40 = vperm.slane %v4660_v35, %v2997_v13  ;;  %v1154_v5 = vld [vmem:[%s4535_s1 + $0x390] sm:$0xff] }
 0x2de   :  { %v4176_v30 = vpop.xlane.xlu2 %921  ;;  %v4178_v0 = vpop.xlane.xlu1 %879  ;;  %2077 = vmatpush.msrb.mxu1 %v1131_v10  ;;  %2122 = vmatpush.msrb.mxu3 %v1158_v21 }
 0x2df   :  { %v4180_v57 = vpop.xlane.xlu0 %1020  ;;  %2107 = vmatpush.msrb.mxu2 %v1137_v1  ;;  %2065 = vmatpush.msrb.mxu0 %v1107_v9  ;;  %v1590_v1 = vsel %vm1441_vm3, %v1589_v32, %v1588_v52  ;;  %v1599_v32 = vperm.slane %v4664_v27, %v3029_v14  ;;  %v1124_v52 = vld [vmem:[%s4535_s1 + $0x2a0] sm:$0xff]  ;;  %v1915_v27 = vperm.slane %v4138_v11, %v3056_v59 }
 0x2e0   :  { %2078 = vmatpush.msrb.mxu1 %v1130_v39  ;;  %2123 = vmatpush.msrb.mxu3 %v1157_v8  ;;  %v1592_v48 = vsel %vm1445_vm4, %v1591_v40, %v1590_v1  ;;  %v4665_v8 = vld [vmem:[#allocation51_spill] sm:$0xff]  ;;  %v4666_v40 = vld [vmem:[#allocation56_spill] sm:$0xff] }
 0x2e1   :  { %2108 = vmatpush.msrb.mxu2 %v1136_v26  ;;  %2066 = vmatpush.msrb.mxu0 %v1106_v20  ;;  %v1595_v26 = vperm.slane %v4662_v42, %v3012_v4  ;;  %v1594_v9 = vsel %vm1449_vm5, %v1593_v49, %v1592_v48  ;;  %v4663_v20 = vld [vmem:[#allocation42_spill] sm:$0xff]  ;;  %v1615_v35 = vperm.slane %v4665_v8, %v2967_v25  ;;  %v4669_v25 = vld [vmem:[#allocation55_spill] sm:$0xff]  ;;  %v4675_v8 = vld [vmem:[#allocation49_spill] sm:$0xff] }
 0x2e2   :  { %2079 = vmatpush.msrb.mxu1 %v1129_v46  ;;  %2124 = vmatpush.msrb.mxu3 %v1156_v6  ;;  %v1597_v39 = vperm.slane %v4663_v20, %v3023_v16  ;;  %v1123_v46 = vld [vmem:[%s4535_s1 + $0x298] sm:$0xff]  ;;  %v4667_v6 = vld [vmem:[#allocation46_spill] sm:$0xff]  ;;  %v1911_v48 = vperm.slane %v4100_v45, %v3039_v24 }
 0x2e3   :  { %2067 = vmatpush.msrb.mxu0 %v1105_v55  ;;  %v1596_v21 = vsel %vm1453_vm6, %v1595_v26, %v1594_v9  ;;  %v1152_v55 = vld [vmem:[%s4535_s1 + $0x380] sm:$0xff]  ;;  %v1601_v1 = vperm.slane %v4667_v6, %v3039_v24  ;;  %v1121_v9 = vld [vmem:[%s4535_s1 + $0x288] sm:$0xff] }
 0x2e4   :  { %2080 = vmatpush.msrb.mxu1 %v1128_v43  ;;  %2125 = vmatpush.msrb.mxu3 %v1155_v18  ;;  %v1122_v43 = vld [vmem:[%s4535_s1 + $0x290] sm:$0xff]  ;;  %v1598_v23 = vsel %vm1457_vm7, %v1597_v39, %v1596_v21  ;;  %v1913_v39 = vperm.slane %v4112_v38, %v3047_v7 }
 0x2e5   :  { %2068 = vmatpush.msrb.mxu0 %v1104_v3  ;;  %v1616_v3 = vperm.slane %v4666_v40, %v2971_v44  ;;  %v1600_v49 = vsel %vm4668_vm9, %v1599_v32, %v1598_v23  ;;  %v1618_v44 = vperm.slane %v4669_v25, %v2982_v50  ;;  %v4673_v21 = vld [vmem:[#allocation54_spill] sm:$0xff]  ;;  %vm4681_vm9 = vmmov %vm4678_vm10 }
 0x2e6   :  { %v4224_v22 = vpop.xlane.xlu2 %882  ;;  %v4226_v58 = vpop.xlane.xlu1 %1023  ;;  %2081 = vmatpush.msrb.mxu1 %v1127_v19  ;;  %2126 = vmatpush.msrb.mxu3 %v1154_v5  ;;  %v4670_v5 = vld [vmem:[#allocation45_spill] sm:$0xff]  ;;  %v1602_v50 = vsel %vm4671_vm0, %v1601_v1, %v1600_v49  ;;  %v1620_v45 = vperm.slane %v4673_v21, %v2988_v61  ;;  %v1912_v61 = vsel %vm4677_vm8, %v1911_v48, %v4076_v56  ;;  %v4682_v56 = vld [vmem:[#allocation48_spill] sm:$0xff]  ;;  %v4685_v21 = vld [vmem:[#allocation62_spill] sm:$0xff] }
 0x2e7   :  { %v4228_v17 = vpop.xlane.xlu0 %981  ;;  %v1603_v42 = vperm.slane %v4670_v5, %v3047_v7  ;;  %v1617_v26 = vsel %vm1433_vm1, %v1616_v3, %v1615_v35  ;;  %v1607_v35 = vperm.slane %v4675_v8, %v3073_v36  ;;  %vm4676_vm1 = vcmask 720512  }
 0x2e8   :  { %2082 = vmatpush.msrb.mxu1 %v1126_v29  ;;  %2127 = vmatpush.msrb.mxu3 %v1153_v2  ;;  %v4672_v2 = vld [vmem:[#allocation50_spill] sm:$0xff]  ;;  %v1619_v32 = vsel %vm1437_vm2, %v1618_v44, %v1617_v26  ;;  %vm4679_vm2 = vmmov %vm4676_vm1  ;;  %v1849_v44 = vperm.slane %v4141_v33, %v3039_v24  ;;  %v1853_v33 = vperm.slane %v4224_v22, %v3056_v59 }
 0x2e9   :  { %v1605_v20 = vperm.slane %v4672_v2, %v3056_v59  ;;  %v1604_v38 = vsel %vm4676_vm1, %v1603_v42, %v1602_v50  ;;  %v1914_v3 = vsel %vm4679_vm2, %v1913_v39, %v1912_v61  ;;  %v1621_v6 = vsel %vm1441_vm3, %v1620_v45, %v1619_v32  ;;  %v4684_v50 = vld [vmem:[#allocation57_spill] sm:$0xff]  ;;  %vm4686_vm3 = vmmov %vm4671_vm0 }
 0x2ea   :  { %2083 = vmatpush.msrb.mxu1 %v1125_v28  ;;  %2128 = vmatpush.msrb.mxu3 %v1152_v55  ;;  %v1120_v28 = vld [vmem:[%s4535_s1 + $0x280] sm:$0xff]  ;;  %v1916_v1 = vsel %vm4681_vm9, %v1915_v27, %v1914_v3  ;;  %v1851_v42 = vperm.slane %v4178_v0, %v3047_v7  ;;  %v1626_v2 = vperm.slane %v4684_v50, %v3012_v4  ;;  %vm4697_vm8 = vmmov %vm4676_vm1 }
 0x2eb   :  { %v1606_v40 = vsel %vm4678_vm10, %v1605_v20, %v1604_v38  ;;  %v1628_v0 = vperm.slane %v4685_v21, %v3023_v16  ;;  %v1850_v32 = vsel %vm4686_vm3, %v1849_v44, %v4103_v54  ;;  %vm4703_vm3 = vmmov %vm4671_vm0 }
 0x2ec   :  { %2084 = vmatpush.msrb.mxu1 %v1124_v52  ;;  %v4674_v52 = vld [vmem:[#allocation59_spill] sm:$0xff] }
 0x2ed   :  { %v1622_v55 = vperm.slane %v4674_v52, %v2997_v13  ;;  %v4687_v52 = vld [vmem:[#allocation69_spill] sm:$0xff] }
 0x2ee   :  { %v4279_v12 = vpop.xlane.xlu2 %1026  ;;  %v4281_v62 = vpop.xlane.xlu1 %984  ;;  %2085 = vmatpush.msrb.mxu1 %v1123_v46  ;;  %v1917_v46 = vperm.slane %v4228_v17, %v3073_v36  ;;  %v4680_v17 = vld [vmem:[#allocation58_spill] sm:$0xff] }
 0x2ef   :  { %v4285_v31 = vpop.xlane.xlu0 %924  ;;  %v1919_v11 = vperm.slane %v4281_v62, %v3060_v51  ;;  %v1609_v62 = vperm.slane %v4682_v56, %v3060_v51  ;;  %v1623_v25 = vsel %vm1445_vm4, %v1622_v55, %v1621_v6  ;;  %v4688_v55 = vld [vmem:[#allocation52_spill] sm:$0xff]  ;;  %vm4689_vm4 = vmmov %vm4676_vm1 }
 0x2f0   :  { %2086 = vmatpush.msrb.mxu1 %v1122_v43  ;;  %v1624_v43 = vperm.slane %v4680_v17, %v3002_v63  ;;  %v1608_v63 = vsel %vm1477_vm12, %v1607_v35, %v1606_v40  ;;  %v1852_v8 = vsel %vm4689_vm4, %v1851_v42, %v1850_v32  ;;  %v4690_v35 = vld [vmem:[#allocation61_spill] sm:$0xff]  ;;  %v1942_v17 = vperm.slane %v4180_v57, %v3039_v24  ;;  %vm4705_vm4 = vmmov %vm4676_vm1 }
 0x2f1   :  { %v1630_v38 = vperm.slane %v4690_v35, %v3029_v14  ;;  %v4704_v35 = vld [vmem:[#allocation67_spill] sm:$0xff] }
 0x2f2   :  { %2087 = vmatpush.msrb.mxu1 %v1121_v9  ;;  %v4683_v9 = vld [vmem:[#allocation53_spill] sm:$0xff]  ;;  %v1625_v39 = vsel %vm1449_vm5, %v1624_v43, %v1623_v25  ;;  %vm4691_vm5 = vmmov %vm4681_vm9 }
 0x2f3   :  { %v1627_v54 = vsel %vm1453_vm6, %v1626_v2, %v1625_v39  ;;  %vm4693_vm6 = vcmask 589312   ;;  %vm4698_vm10 = vmmov %vm4691_vm5 }
 0x2f4   :  { %2088 = vmatpush.msrb.mxu1 %v1120_v28  ;;  %v1611_v28 = vperm.slane %v4683_v9, %v3070_v53  ;;  %vm4700_vm2 = vmmov %vm4691_vm5 }
 0x2f5   :  { %vm4702_vm9 = vmmov %vm4693_vm6 }
 0x2f6   :  { %v4326_v60 = vpop.xlane.xlu2 %987  ;;  %v4328_v41 = vpop.xlane.xlu1 %927 }
 0x2f7   :  { %v4331_v10 = vpop.xlane.xlu0 %885  ;;  %v1921_v13 = vperm.slane %v4326_v60, %v3070_v53  ;;  %v1918_v60 = vsel %vm1477_vm12, %v1917_v46, %v1916_v1  ;;  %v1613_v46 = vperm.slane %v4688_v55, %v3096_v34 }
 0x2f8   :  { %v1920_v26 = vsel %vm1481_vm13, %v1919_v11, %v1918_v60  ;;  %v1855_v45 = vperm.slane %v4331_v10, %v3073_v36  ;;  %v1610_v10 = vsel %vm1481_vm13, %v1609_v62, %v1608_v63  ;;  %v1629_v11 = vsel %vm1457_vm7, %v1628_v0, %v1627_v54  ;;  %vm4695_vm7 = vmmov %vm4671_vm0  ;;  %v4699_v0 = vld [vmem:[#allocation63_spill] sm:$0xff] }
 0x2f9   :  { %v1922_v20 = vsel %vm1485_vm14, %v1921_v13, %v1920_v26  ;;  %v1612_v61 = vsel %vm1485_vm14, %v1611_v28, %v1610_v10  ;;  %v1944_v62 = vperm.slane %v4226_v58, %v3047_v7  ;;  %v1631_v60 = vsel %vm4693_vm6, %v1630_v38, %v1629_v11  ;;  %v4696_v28 = vld [vmem:[#allocation64_spill] sm:$0xff] }
 0x2fa   :  { %v1614_v44 = vsel %vm1489_vm15, %v1613_v46, %v1612_v61  ;;  %v1946_v63 = vperm.slane %v4279_v12, %v3056_v59  ;;  %v1943_v58 = vsel %vm4695_vm7, %v1942_v17, %v4120_v37  ;;  %v1636_v50 = vperm.slane %v4696_v28, %v3056_v59 }
 0x2fb   :  { %v1945_v12 = vsel %vm4676_vm1, %v1944_v62, %v1943_v58  ;;  %v2030_v62 = vpop.f32.mrf.mxu2 }
 0x2fc   :  { %v1947_v37 = vsel %vm4698_vm10, %v1946_v63, %v1945_v12 }
 0x2fe   :  { %v4364_v19 = vpop.xlane.xlu2 %930  ;;  %v4366_v18 = vpop.xlane.xlu1 %888 }
 0x2ff   :  { %v4370_v29 = vpop.xlane.xlu0 %1029  ;;  %v1857_v4 = vperm.slane %v4366_v18, %v3060_v51  ;;  %v1854_v18 = vsel %vm4691_vm5, %v1853_v33, %v1852_v8  ;;  %vm4706_vm5 = vmmov %vm4700_vm2 }
 0x300   :  { %v1856_v40 = vsel %vm1477_vm12, %v1855_v45, %v1854_v18  ;;  %v1948_v26 = vperm.slane %v4370_v29, %v3073_v36  ;;  %v1638_v45 = vperm.slane %v4699_v0, %v3073_v36  ;;  %v4707_v18 = vld [vmem:[#allocation66_spill] sm:$0xff] }
 0x301   :  { %v1858_v43 = vsel %vm1481_vm13, %v1857_v4, %v1856_v40  ;;  %v1644_v61 = vperm.slane %v4707_v18, %v3096_v34 }
 0x302   :  { %v1949_v39 = vsel %vm1477_vm12, %v1948_v26, %v1947_v37 }
 0x306   :  { %v892_v23 = vpop.xlane.xlu2 %891  ;;  %v4412_v49 = vpop.xlane.xlu1 %1032 }
 0x307   :  { %v991_v5 = vpop.xlane.xlu0 %990  ;;  %v1859_v16 = vperm.slane %v892_v23, %v3070_v53  ;;  %v4692_v23 = vld [vmem:[#allocation60_spill] sm:$0xff]  ;;  %v1950_v9 = vperm.slane %v4412_v49, %v3060_v51  ;;  %v1880_v49 = vperm.slane %v4285_v31, %v3039_v24 }
 0x308   :  { %v1923_v48 = vperm.slane %v991_v5, %v3096_v34  ;;  %v1632_v56 = vperm.slane %v4692_v23, %v3039_v24  ;;  %v4694_v5 = vld [vmem:[#allocation65_spill] sm:$0xff]  ;;  %v1884_v24 = vperm.slane %v4364_v19, %v3056_v59  ;;  %v1642_v59 = vperm.slane %v4704_v35, %v3070_v53  ;;  %v2010_v23 = vpop.f32.mrf.mxu1 }
 0x309   :  { %v1860_v25 = vsel %vm1485_vm14, %v1859_v16, %v1858_v43  ;;  %v1634_v57 = vperm.slane %v4694_v5, %v3047_v7  ;;  %v1951_v32 = vsel %vm1481_vm13, %v1950_v9, %v1949_v39 }
 0x30a   :  { %v1924_v27 = vsel %vm1489_vm15, %v1923_v48, %v1922_v20  ;;  %v1633_v2 = vsel %vm4671_vm0, %v1632_v56, %v1631_v60  ;;  %v1878_v20 = vperm.slane %v4176_v30, %v3029_v14  ;;  %v4701_v30 = vld [vmem:[#allocation68_spill] sm:$0xff] }
 0x30b   :  { %v1963_v22 = vsel %vm1956_vm11, %v1924_v27, %v4687_v52  ;;  %v1635_v29 = vsel %vm4697_vm8, %v1634_v57, %v1633_v2  ;;  %v1882_v27 = vperm.slane %v4328_v41, %v3047_v7 }
 0x30c   :  { %2109 = vmatmul.f32.vlgmr.msrb.gmra.mxu2 %v1963_v22  ;;  %v1637_v14 = vsel %vm4700_vm2, %v1636_v50, %v1635_v29  ;;  %v1640_v22 = vperm.slane %v4701_v30, %v3060_v51  ;;  %v1879_v55 = vsel %vm4702_vm9, %v1878_v20, %v4150_v47 }
 0x30d   :  { %v1881_v46 = vsel %vm4703_vm3, %v1880_v49, %v1879_v55  ;;  %v1639_v19 = vsel %vm1477_vm12, %v1638_v45, %v1637_v14 }
 0x30e   :  { %v895_v3 = vpop.xlane.xlu2 %894  ;;  %v1036_v13 = vpop.xlane.xlu1 %1035  ;;  %v1883_v38 = vsel %vm4705_vm4, %v1882_v27, %v1881_v46 }
 0x30f   :  { %v1861_v6 = vperm.slane %v895_v3, %v3096_v34  ;;  %v934_v1 = vpop.xlane.xlu0 %933  ;;  %v1952_v33 = vperm.slane %v1036_v13, %v3070_v53  ;;  %v1885_v47 = vsel %vm4706_vm5, %v1884_v24, %v1883_v38 }
 0x310   :  { %v1886_v7 = vperm.slane %v934_v1, %v3073_v36  ;;  %v1641_v36 = vsel %vm1481_vm13, %v1640_v22, %v1639_v19  ;;  %v1990_v1 = vpop.f32.mrf.mxu0 }
 0x311   :  { %v1862_v42 = vsel %vm1489_vm15, %v1861_v6, %v1860_v25  ;;  %v1953_v31 = vsel %vm1485_vm14, %v1952_v33, %v1951_v32  ;;  %v1643_v40 = vsel %vm1485_vm14, %v1642_v59, %v1641_v36 }
 0x312   :  { %v1961_v48 = vsel %vm1956_vm11, %v1862_v42, %v1614_v44  ;;  %v1887_v54 = vsel %vm1477_vm12, %v1886_v7, %v1885_v47  ;;  %v1645_v17 = vsel %vm1489_vm15, %v1644_v61, %v1643_v40 }
 0x313   :  { %2069 = vmatmul.f32.vlgmr.msrb.gmra.mxu0 %v1961_v48 }
 0x316   :  { %v1039_v21 = vpop.xlane.xlu1 %1038  ;;  %v940_v16 = vpop.xlane.xlu2 %939 }
 0x317   :  { %v1954_v4 = vperm.slane %v1039_v21, %v3096_v34  ;;  %v937_v52 = vpop.xlane.xlu0 %936 }
 0x318   :  { %v1888_v8 = vperm.slane %v937_v52, %v3060_v51  ;;  %v1890_v51 = vperm.slane %v940_v16, %v3070_v53  ;;  %v2152_v53 = vld [vmem:[%s4536_s2] ss:$0 sm:$0xff] }
 0x319   :  { %v1955_v41 = vsel %vm1489_vm15, %v1954_v4, %v1953_v31  ;;  %v1991_v56 = vadd.f32 %v2152_v53, %v1990_v1 }
 0x31a   :  { %v1964_v10 = vsel %vm1956_vm11, %v1955_v41, %v3234_v15  ;;  %v1889_v15 = vsel %vm1481_vm13, %v1888_v8, %v1887_v54 }
 0x31b   :  { %2129 = vmatmul.f32.vlgmr.msrb.gmra.mxu3 %v1964_v10  ;;  %v1891_v13 = vsel %vm1485_vm14, %v1890_v51, %v1889_v15  ;;  %v2011_v25 = vadd.f32 %v2010_v23, %v1991_v56 }
 0x31f   :  { %v943_v11 = vpop.xlane.xlu0 %942 }
 0x320   :  { %v1892_v3 = vperm.slane %v943_v11, %v3096_v34  ;;  %v2031_v34 = vadd.f32 %v2030_v62, %v2011_v25 }
 0x322   :  { %v1893_v43 = vsel %vm1489_vm15, %v1892_v3, %v1891_v13 }
 0x323   :  { %v1962_v6 = vsel %vm1956_vm11, %v1893_v43, %v1645_v17  ;;  %vm2133_vm11 = vcmask 58368  }
 0x324   :  { %2089 = vmatmul.f32.vlgmr.msrb.gmra.mxu1 %v1962_v6 }
 0x347   :  { %v2050_v44 = vpop.f32.mrf.mxu3 }
 0x348   :  { %v2051_v5 = vadd.f32 %v2050_v44, %v2031_v34 }
 0x38f   :  { %v2110_v26 = vpop.f32.mrf.mxu2 }
 0x390   :  { %v2070_v60 = vpop.f32.mrf.mxu0 }
 0x391   :  { %v2071_v57 = vadd.f32 %v2070_v60, %v2051_v5 }
 0x39e   :  { %v2130_v58 = vpop.f32.mrf.mxu3 }
 0x3a1   :  { %v2090_v63 = vpop.f32.mrf.mxu1 }
 0x3a2   :  { %v2091_v42 = vadd.f32 %v2090_v63, %v2071_v57 }
 0x3a4   :  { %v2111_v48 = vadd.f32 %v2110_v26, %v2091_v42 }
 0x3a6   :  { %v2131_v9 = vadd.f32 %v2130_v58, %v2111_v48 }
 0x3a8   :  { %2134 = vst.msk [vmem:[#allocation2] sm:$0x3] %vm2133_vm11, %v2131_v9 }
 0x3a9   :  { %2145 = dma.vmem_to_hbm [thread:$0]  %s2141_s21, 32, %s2143_s24, [#allocation3]  }
 0x3aa   :  { %2177 = dma.done.wait [#allocation3], 32  }
 0x3ab   :  { %2178 = vsyncadd [#allocation3], 4294967264 }
 0x3ac   :  { %2150 = vsyncpa [#allocation3], 1 }

</bundles_post_ra>
